<compile_context>
chip_gen: v6e
topology: v6e:2x2x1
jax: 0.10.0
libtpu: 0.0.40
codegen_flags: <defaults>
</compile_context>

<pallas_src>
import functools

import jax
import jax.numpy as jnp
from jax import lax
from jax.experimental import pallas as pl
from jax.experimental.pallas import tpu as pltpu

INPUT_SIZE = 448
HIDDEN_SIZE = 64
OUTPUT_SIZE = 3
NUM_LAYERS = 2


def _rnn_classifier_kernel(x_ref,       # (B, TT, D)  batch-first input time tile
                           wih0_ref,    # (D, H)      layer-0 input weights (transposed)
                           whh0_ref,    # (H, H)      layer-0 recurrent weights (transposed)
                           b0_ref,      # (1, H)      layer-0 combined bias (b_ih + b_hh)
                           w1_ref,      # (2H, H)     layer-1 stacked [Wih1; Whh1] (transposed)
                           b1_ref,      # (1, H)      layer-1 combined bias
                           wfc_ref,     # (H, O)      fc weights (transposed)
                           bfc_ref,     # (1, O)      fc bias
                           out_ref,     # (B, O)
                           h0_scr,      # (B, H)      layer-0 hidden state (carried across grid)
                           h1_scr,      # (B, H)      layer-1 hidden state (carried across grid)
                           u_scr):      # (B*TT, H)   hoisted layer-0 input projection
    B, TT, D = x_ref.shape
    H = whh0_ref.shape[0]
    t_blk = pl.program_id(0)

    @pl.when(t_blk == 0)
    def _init():
        h0_scr[...] = jnp.zeros_like(h0_scr)
        h1_scr[...] = jnp.zeros_like(h1_scr)

    # ---- Hoisted layer-0 input projection: one big MXU matmul per time tile.
    # Row b*TT + t of u_scr holds (x[b, t, :] @ Wih0 + b_ih0 + b_hh0).
    x_flat = x_ref[...].reshape(B * TT, D)
    u_scr[...] = (jnp.dot(x_flat, wih0_ref[...], preferred_element_type=jnp.float32)
                  + b0_ref[...])

    # Small (64x64 / 128x64) weights held as values across the recurrence.
    whh0 = whh0_ref[...]
    w1 = w1_ref[...]
    b1 = jnp.broadcast_to(b1_ref[...], (B, H))   # hoisted: no per-step broadcast_in_dim

    def step(t, carry):
        h0, h1 = carry
        # Gather the B projected-input rows for timestep t (row index = b*TT + t).
        rows = [u_scr[pl.ds(b * TT + t, 1), :] for b in range(B)]
        u_t = rows[0] if B == 1 else jnp.concatenate(rows, axis=0)      # (B, H)
        h0_new = jnp.tanh(
            u_t + jnp.dot(h0, whh0, preferred_element_type=jnp.float32))
        # Fused layer-1 matmul: [h0_new | h1] @ [Wih1; Whh1], K = 2H = 128.
        cat = jnp.concatenate([h0_new, h1], axis=1)                     # (B, 2H)
        h1_new = jnp.tanh(
            jnp.dot(cat, w1, preferred_element_type=jnp.float32) + b1)
        return h0_new, h1_new

    h0, h1 = lax.fori_loop(0, TT, step, (h0_scr[...], h1_scr[...]),
                           unroll=min(8, TT))
    h0_scr[...] = h0
    h1_scr[...] = h1

    # out[:, -1, :] -> relu -> fc, only after the final time tile.
    @pl.when(t_blk == pl.num_programs(0) - 1)
    def _finalize():
        feat = jnp.maximum(h1, 0.0)
        out_ref[...] = (jnp.dot(feat, wfc_ref[...], preferred_element_type=jnp.float32)
                        + bfc_ref[...]).astype(out_ref.dtype)


def _choose_time_tile(T, max_tile):
    """Largest legal time tile: full T if small, else an 8-aligned divisor of T."""
    if T <= max_tile:
        return T
    start = max_tile - (max_tile % 8)
    for tt in range(start, 7, -8):
        if T % tt == 0:
            return tt
    return T   # no aligned divisor: fall back to a single resident block


def _const_spec(shape):
    zeros = (0,) * len(shape)
    return pl.BlockSpec(shape, lambda t, _z=zeros: _z)


@functools.partial(jax.jit, static_argnames=("time_tile", "mxu_dtype"))
def rnn_classifier_forward(x, params, *, time_tile=64, mxu_dtype=jnp.float32):
    """x: (B, T, input_size) float32, batch_first as in the PyTorch module.

    mxu_dtype: dtype of the heavy input-projection operands (x, Wih0).  Use
    jnp.bfloat16 on v6e/v7x to halve HBM/VMEM traffic for x; recurrent and
    elementwise math always stays f32.
    """
    B, T, D = x.shape
    H = params["whh0"].shape[0]
    O = params["wfc"].shape[0]
    TT = _choose_time_tile(T, time_tile)
    grid = (T // TT,)

    args = (
        x.astype(mxu_dtype),                                           # (B, T, D)
        params["wih0"].T.astype(mxu_dtype),                            # (D, H)
        params["whh0"].T.astype(jnp.float32),                          # (H, H)
        (params["bih0"] + params["bhh0"]).reshape(1, H).astype(jnp.float32),
        jnp.concatenate([params["wih1"].T, params["whh1"].T],
                        axis=0).astype(jnp.float32),                   # (2H, H)
        (params["bih1"] + params["bhh1"]).reshape(1, H).astype(jnp.float32),
        params["wfc"].T.astype(jnp.float32),                           # (H, O)
        params["bfc"].reshape(1, O).astype(jnp.float32),
    )

    in_specs = [
        pl.BlockSpec((B, TT, D), lambda t: (0, t, 0)),   # streamed time tiles of x
        _const_spec((D, H)),
        _const_spec((H, H)),
        _const_spec((1, H)),
        _const_spec((2 * H, H)),
        _const_spec((1, H)),
        _const_spec((H, O)),
        _const_spec((1, O)),
    ]

    grid_spec = pltpu.PrefetchScalarGridSpec(
        num_scalar_prefetch=0,
        grid=grid,
        in_specs=in_specs,
        out_specs=pl.BlockSpec((B, O), lambda t: (0, 0)),
        scratch_shapes=[
            pltpu.VMEM((B, H), jnp.float32),        # h0 carried across time tiles
            pltpu.VMEM((B, H), jnp.float32),        # h1 carried across time tiles
            pltpu.VMEM((B * TT, H), jnp.float32),   # hoisted input projection
        ],
    )

    return pl.pallas_call(
        _rnn_classifier_kernel,
        out_shape=jax.ShapeDtypeStruct((B, O), jnp.float32),
        grid_spec=grid_spec,
        compiler_params=pltpu.CompilerParams(
            dimension_semantics=("arbitrary",),   # serial recurrence over time
            vmem_limit_bytes=32 << 20,            # headroom on v7x's 64 MiB VMEM
        ),
    )(*args)


def init_params(key, input_size=INPUT_SIZE, hidden_size=HIDDEN_SIZE,
                output_size=OUTPUT_SIZE):
    """Deterministic init mirroring PyTorch's U(-1/sqrt(H), 1/sqrt(H))."""
    ks = jax.random.split(key, 10)
    bound = 1.0 / jnp.sqrt(jnp.float32(hidden_size))
    u = lambda k, shape: jax.random.uniform(k, shape, jnp.float32, -bound, bound)
    return {
        # layer 0
        "wih0": u(ks[0], (hidden_size, input_size)),
        "whh0": u(ks[1], (hidden_size, hidden_size)),
        "bih0": u(ks[2], (hidden_size,)),
        "bhh0": u(ks[3], (hidden_size,)),
        # layer 1
        "wih1": u(ks[4], (hidden_size, hidden_size)),
        "whh1": u(ks[5], (hidden_size, hidden_size)),
        "bih1": u(ks[6], (hidden_size,)),
        "bhh1": u(ks[7], (hidden_size,)),
        # fc
        "wfc": u(ks[8], (output_size, hidden_size)),
        "bfc": u(ks[9], (output_size,)),
    }


def reference_forward(x, params):
    """Pure-JAX reference of the PyTorch forward (eval mode, no dropout)."""
    B, T, _ = x.shape
    H = params["whh0"].shape[0]
    h0 = jnp.zeros((B, H), jnp.float32)
    h1 = jnp.zeros((B, H), jnp.float32)
    for t in range(T):
        xt = x[:, t, :]
        h0 = jnp.tanh(xt @ params["wih0"].T + params["bih0"]
                      + h0 @ params["whh0"].T + params["bhh0"])
        h1 = jnp.tanh(h0 @ params["wih1"].T + params["bih1"]
                      + h1 @ params["whh1"].T + params["bhh1"])
    feat = jnp.maximum(h1, 0.0)
    return feat @ params["wfc"].T + params["bfc"]


if __name__ == "__main__":
    key = jax.random.PRNGKey(0)
    kx, kp = jax.random.split(key)

    B, T = 2, 8
    x = jax.random.normal(kx, (B, T, INPUT_SIZE), jnp.float32)
    params = init_params(kp)

    out = rnn_classifier_forward(x, params)
    out = jax.block_until_ready(out)

    ref = reference_forward(x, params)
    assert out.shape == (B, OUTPUT_SIZE)
    assert jnp.allclose(out, ref, atol=1e-4, rtol=1e-4), (out, ref)

    print("KERNEL_OK")
</pallas_src>

<mosaic_0001>
module attributes {stable_mosaic.version = 11 : i64} {
  func.func @_rnn_classifier_kernel(%arg0: i32, %arg1: memref<2x8x448xf32, #tpu.memory_space<vmem>>, %arg2: memref<448x64xf32, #tpu.memory_space<vmem>>, %arg3: memref<64x64xf32, #tpu.memory_space<vmem>>, %arg4: memref<1x64xf32, #tpu.memory_space<vmem>>, %arg5: memref<128x64xf32, #tpu.memory_space<vmem>>, %arg6: memref<1x64xf32, #tpu.memory_space<vmem>>, %arg7: memref<64x3xf32, #tpu.memory_space<vmem>>, %arg8: memref<1x3xf32, #tpu.memory_space<vmem>>, %arg9: memref<2x3xf32, #tpu.memory_space<vmem>>, %arg10: memref<2x64xf32, #tpu.memory_space<vmem>>, %arg11: memref<2x64xf32, #tpu.memory_space<vmem>>, %arg12: memref<16x64xf32, #tpu.memory_space<vmem>>) attributes {dimension_semantics = [#tpu.dimension_semantics<arbitrary>], iteration_bounds = array<i64: 1>, scalar_prefetch = 0 : i64, scratch_operands = 3 : i64, tpu.core_type = #tpu.core_type<tc>, window_params = [{transform_indices = @transform_0, window_bounds = array<i64: 2, 8, 448>}, {pipeline_mode = #tpu.pipeline_mode<synchronous>, transform_indices = @transform_1, window_bounds = array<i64: 448, 64>}, {pipeline_mode = #tpu.pipeline_mode<synchronous>, transform_indices = @transform_2, window_bounds = array<i64: 64, 64>}, {pipeline_mode = #tpu.pipeline_mode<synchronous>, transform_indices = @transform_3, window_bounds = array<i64: 1, 64>}, {pipeline_mode = #tpu.pipeline_mode<synchronous>, transform_indices = @transform_4, window_bounds = array<i64: 128, 64>}, {pipeline_mode = #tpu.pipeline_mode<synchronous>, transform_indices = @transform_5, window_bounds = array<i64: 1, 64>}, {pipeline_mode = #tpu.pipeline_mode<synchronous>, transform_indices = @transform_6, window_bounds = array<i64: 64, 3>}, {pipeline_mode = #tpu.pipeline_mode<synchronous>, transform_indices = @transform_7, window_bounds = array<i64: 1, 3>}, {pipeline_mode = #tpu.pipeline_mode<synchronous>, transform_indices = @transform_8, window_bounds = array<i64: 2, 3>}]} {
    %c0_i32 = arith.constant 0 : i32
    %0 = arith.cmpi eq, %arg0, %c0_i32 : i32
    %1 = arith.extui %0 : i1 to i32
    %c0_i32_0 = arith.constant 0 : i32
    %2 = arith.cmpi ne, %1, %c0_i32_0 : i32
    scf.if %2 {
      %cst_74 = arith.constant 0.000000e+00 : f32
      %135 = vector.broadcast %cst_74 : f32 to vector<2x64xf32>
      %c0_75 = arith.constant 0 : index
      %c0_76 = arith.constant 0 : index
      %136 = vector.load %arg10[%c0_75, %c0_76] : memref<2x64xf32, #tpu.memory_space<vmem>>, vector<2x64xf32>
      tpu.vector_store %arg10[%c0_75, %c0_76], %135 {strides = array<i32>} : memref<2x64xf32, #tpu.memory_space<vmem>>, vector<2x64xf32>,
      %cst_77 = arith.constant 0.000000e+00 : f32
      %137 = vector.broadcast %cst_77 : f32 to vector<2x64xf32>
      %c0_78 = arith.constant 0 : index
      %c0_79 = arith.constant 0 : index
      %138 = vector.load %arg11[%c0_78, %c0_79] : memref<2x64xf32, #tpu.memory_space<vmem>>, vector<2x64xf32>
      tpu.vector_store %arg11[%c0_78, %c0_79], %137 {strides = array<i32>} : memref<2x64xf32, #tpu.memory_space<vmem>>, vector<2x64xf32>,
    } else {
    }
    %c0 = arith.constant 0 : index
    %c0_1 = arith.constant 0 : index
    %c0_2 = arith.constant 0 : index
    %3 = vector.load %arg1[%c0, %c0_1, %c0_2] : memref<2x8x448xf32, #tpu.memory_space<vmem>>, vector<2x8x448xf32>
    %4 = vector.shape_cast %3 : vector<2x8x448xf32> to vector<16x448xf32>
    %c0_3 = arith.constant 0 : index
    %c0_4 = arith.constant 0 : index
    %5 = vector.load %arg2[%c0_3, %c0_4] : memref<448x64xf32, #tpu.memory_space<vmem>>, vector<448x64xf32>
    %cst = arith.constant dense<0.000000e+00> : vector<16x64xf32>
    %6 = tpu.matmul %4, %5, %cst {dimension_numbers = #tpu.dot_dimension_numbers<[1], [0], [0], [1], [0, 0, 1, 1], [], []>} : vector<16x448xf32>, vector<448x64xf32>, vector<16x64xf32> -> vector<16x64xf32>
    %c0_5 = arith.constant 0 : index
    %c0_6 = arith.constant 0 : index
    %7 = vector.load %arg4[%c0_5, %c0_6] : memref<1x64xf32, #tpu.memory_space<vmem>>, vector<1x64xf32>
    %8 = vector.broadcast %7 : vector<1x64xf32> to vector<16x64xf32>
    %9 = arith.addf %6, %8 : vector<16x64xf32>
    %c0_7 = arith.constant 0 : index
    %c0_8 = arith.constant 0 : index
    %10 = vector.load %arg12[%c0_7, %c0_8] : memref<16x64xf32, #tpu.memory_space<vmem>>, vector<16x64xf32>
    tpu.vector_store %arg12[%c0_7, %c0_8], %9 {strides = array<i32>} : memref<16x64xf32, #tpu.memory_space<vmem>>, vector<16x64xf32>,
    %c0_9 = arith.constant 0 : index
    %c0_10 = arith.constant 0 : index
    %11 = vector.load %arg3[%c0_9, %c0_10] : memref<64x64xf32, #tpu.memory_space<vmem>>, vector<64x64xf32>
    %c0_11 = arith.constant 0 : index
    %c0_12 = arith.constant 0 : index
    %12 = vector.load %arg5[%c0_11, %c0_12] : memref<128x64xf32, #tpu.memory_space<vmem>>, vector<128x64xf32>
    %c0_13 = arith.constant 0 : index
    %c0_14 = arith.constant 0 : index
    %13 = vector.load %arg6[%c0_13, %c0_14] : memref<1x64xf32, #tpu.memory_space<vmem>>, vector<1x64xf32>
    %14 = vector.shape_cast %13 : vector<1x64xf32> to vector<1x64xf32>
    %15 = vector.broadcast %14 : vector<1x64xf32> to vector<2x64xf32>
    %c0_15 = arith.constant 0 : index
    %c0_16 = arith.constant 0 : index
    %16 = vector.load %arg10[%c0_15, %c0_16] : memref<2x64xf32, #tpu.memory_space<vmem>>, vector<2x64xf32>
    %c0_17 = arith.constant 0 : index
    %c0_18 = arith.constant 0 : index
    %17 = vector.load %arg11[%c0_17, %c0_18] : memref<2x64xf32, #tpu.memory_space<vmem>>, vector<2x64xf32>
    %c0_i32_19 = arith.constant 0 : i32
    %c0_i32_20 = arith.constant 0 : i32
    %18 = arith.addi %c0_i32_20, %c0_i32_19 : i32
    %19 = arith.index_cast %18 : i32 to index
    %c0_21 = arith.constant 0 : index
    %20 = vector.load %arg12[%19, %c0_21] : memref<16x64xf32, #tpu.memory_space<vmem>>, vector<1x64xf32>
    %c8_i32 = arith.constant 8 : i32
    %21 = arith.addi %c8_i32, %c0_i32_19 : i32
    %22 = arith.index_cast %21 : i32 to index
    %c0_22 = arith.constant 0 : index
    %23 = vector.load %arg12[%22, %c0_22] : memref<16x64xf32, #tpu.memory_space<vmem>>, vector<1x64xf32>
    %24 = tpu.concatenate %20, %23 in 0 : vector<1x64xf32>, vector<1x64xf32> -> vector<2x64xf32>
    %cst_23 = arith.constant dense<0.000000e+00> : vector<2x64xf32>
    %25 = tpu.matmul %16, %11, %cst_23 {dimension_numbers = #tpu.dot_dimension_numbers<[1], [0], [0], [1], [0, 0, 1, 1], [], []>} : vector<2x64xf32>, vector<64x64xf32>, vector<2x64xf32> -> vector<2x64xf32>
    %26 = arith.addf %24, %25 : vector<2x64xf32>
    %27 = math.tanh %26 : vector<2x64xf32>
    %28 = tpu.concatenate %27, %17 in 1 : vector<2x64xf32>, vector<2x64xf32> -> vector<2x128xf32>
    %cst_24 = arith.constant dense<0.000000e+00> : vector<2x64xf32>
    %29 = tpu.matmul %28, %12, %cst_24 {dimension_numbers = #tpu.dot_dimension_numbers<[1], [0], [0], [1], [0, 0, 1, 1], [], []>} : vector<2x128xf32>, vector<128x64xf32>, vector<2x64xf32> -> vector<2x64xf32>
    %30 = arith.addf %29, %15 : vector<2x64xf32>
    %31 = math.tanh %30 : vector<2x64xf32>
    %c1_i32 = arith.constant 1 : i32
    %c0_i32_25 = arith.constant 0 : i32
    %32 = arith.addi %c0_i32_25, %c1_i32 : i32
    %33 = arith.index_cast %32 : i32 to index
    %c0_26 = arith.constant 0 : index
    %34 = vector.load %arg12[%33, %c0_26] : memref<16x64xf32, #tpu.memory_space<vmem>>, vector<1x64xf32>
    %c8_i32_27 = arith.constant 8 : i32
    %35 = arith.addi %c8_i32_27, %c1_i32 : i32
    %36 = arith.index_cast %35 : i32 to index
    %c0_28 = arith.constant 0 : index
    %37 = vector.load %arg12[%36, %c0_28] : memref<16x64xf32, #tpu.memory_space<vmem>>, vector<1x64xf32>
    %38 = tpu.concatenate %34, %37 in 0 : vector<1x64xf32>, vector<1x64xf32> -> vector<2x64xf32>
    %cst_29 = arith.constant dense<0.000000e+00> : vector<2x64xf32>
    %39 = tpu.matmul %27, %11, %cst_29 {dimension_numbers = #tpu.dot_dimension_numbers<[1], [0], [0], [1], [0, 0, 1, 1], [], []>} : vector<2x64xf32>, vector<64x64xf32>, vector<2x64xf32> -> vector<2x64xf32>
    %40 = arith.addf %38, %39 : vector<2x64xf32>
    %41 = math.tanh %40 : vector<2x64xf32>
    %42 = tpu.concatenate %41, %31 in 1 : vector<2x64xf32>, vector<2x64xf32> -> vector<2x128xf32>
    %cst_30 = arith.constant dense<0.000000e+00> : vector<2x64xf32>
    %43 = tpu.matmul %42, %12, %cst_30 {dimension_numbers = #tpu.dot_dimension_numbers<[1], [0], [0], [1], [0, 0, 1, 1], [], []>} : vector<2x128xf32>, vector<128x64xf32>, vector<2x64xf32> -> vector<2x64xf32>
    %44 = arith.addf %43, %15 : vector<2x64xf32>
    %45 = math.tanh %44 : vector<2x64xf32>
    %c2_i32 = arith.constant 2 : i32
    %c0_i32_31 = arith.constant 0 : i32
    %46 = arith.addi %c0_i32_31, %c2_i32 : i32
    %47 = arith.index_cast %46 : i32 to index
    %c0_32 = arith.constant 0 : index
    %48 = vector.load %arg12[%47, %c0_32] : memref<16x64xf32, #tpu.memory_space<vmem>>, vector<1x64xf32>
    %c8_i32_33 = arith.constant 8 : i32
    %49 = arith.addi %c8_i32_33, %c2_i32 : i32
    %50 = arith.index_cast %49 : i32 to index
    %c0_34 = arith.constant 0 : index
    %51 = vector.load %arg12[%50, %c0_34] : memref<16x64xf32, #tpu.memory_space<vmem>>, vector<1x64xf32>
    %52 = tpu.concatenate %48, %51 in 0 : vector<1x64xf32>, vector<1x64xf32> -> vector<2x64xf32>
    %cst_35 = arith.constant dense<0.000000e+00> : vector<2x64xf32>
    %53 = tpu.matmul %41, %11, %cst_35 {dimension_numbers = #tpu.dot_dimension_numbers<[1], [0], [0], [1], [0, 0, 1, 1], [], []>} : vector<2x64xf32>, vector<64x64xf32>, vector<2x64xf32> -> vector<2x64xf32>
    %54 = arith.addf %52, %53 : vector<2x64xf32>
    %55 = math.tanh %54 : vector<2x64xf32>
    %56 = tpu.concatenate %55, %45 in 1 : vector<2x64xf32>, vector<2x64xf32> -> vector<2x128xf32>
    %cst_36 = arith.constant dense<0.000000e+00> : vector<2x64xf32>
    %57 = tpu.matmul %56, %12, %cst_36 {dimension_numbers = #tpu.dot_dimension_numbers<[1], [0], [0], [1], [0, 0, 1, 1], [], []>} : vector<2x128xf32>, vector<128x64xf32>, vector<2x64xf32> -> vector<2x64xf32>
    %58 = arith.addf %57, %15 : vector<2x64xf32>
    %59 = math.tanh %58 : vector<2x64xf32>
    %c3_i32 = arith.constant 3 : i32
    %c0_i32_37 = arith.constant 0 : i32
    %60 = arith.addi %c0_i32_37, %c3_i32 : i32
    %61 = arith.index_cast %60 : i32 to index
    %c0_38 = arith.constant 0 : index
    %62 = vector.load %arg12[%61, %c0_38] : memref<16x64xf32, #tpu.memory_space<vmem>>, vector<1x64xf32>
    %c8_i32_39 = arith.constant 8 : i32
    %63 = arith.addi %c8_i32_39, %c3_i32 : i32
    %64 = arith.index_cast %63 : i32 to index
    %c0_40 = arith.constant 0 : index
    %65 = vector.load %arg12[%64, %c0_40] : memref<16x64xf32, #tpu.memory_space<vmem>>, vector<1x64xf32>
    %66 = tpu.concatenate %62, %65 in 0 : vector<1x64xf32>, vector<1x64xf32> -> vector<2x64xf32>
    %cst_41 = arith.constant dense<0.000000e+00> : vector<2x64xf32>
    %67 = tpu.matmul %55, %11, %cst_41 {dimension_numbers = #tpu.dot_dimension_numbers<[1], [0], [0], [1], [0, 0, 1, 1], [], []>} : vector<2x64xf32>, vector<64x64xf32>, vector<2x64xf32> -> vector<2x64xf32>
    %68 = arith.addf %66, %67 : vector<2x64xf32>
    %69 = math.tanh %68 : vector<2x64xf32>
    %70 = tpu.concatenate %69, %59 in 1 : vector<2x64xf32>, vector<2x64xf32> -> vector<2x128xf32>
    %cst_42 = arith.constant dense<0.000000e+00> : vector<2x64xf32>
    %71 = tpu.matmul %70, %12, %cst_42 {dimension_numbers = #tpu.dot_dimension_numbers<[1], [0], [0], [1], [0, 0, 1, 1], [], []>} : vector<2x128xf32>, vector<128x64xf32>, vector<2x64xf32> -> vector<2x64xf32>
    %72 = arith.addf %71, %15 : vector<2x64xf32>
    %73 = math.tanh %72 : vector<2x64xf32>
    %c4_i32 = arith.constant 4 : i32
    %c0_i32_43 = arith.constant 0 : i32
    %74 = arith.addi %c0_i32_43, %c4_i32 : i32
    %75 = arith.index_cast %74 : i32 to index
    %c0_44 = arith.constant 0 : index
    %76 = vector.load %arg12[%75, %c0_44] : memref<16x64xf32, #tpu.memory_space<vmem>>, vector<1x64xf32>
    %c8_i32_45 = arith.constant 8 : i32
    %77 = arith.addi %c8_i32_45, %c4_i32 : i32
    %78 = arith.index_cast %77 : i32 to index
    %c0_46 = arith.constant 0 : index
    %79 = vector.load %arg12[%78, %c0_46] : memref<16x64xf32, #tpu.memory_space<vmem>>, vector<1x64xf32>
    %80 = tpu.concatenate %76, %79 in 0 : vector<1x64xf32>, vector<1x64xf32> -> vector<2x64xf32>
    %cst_47 = arith.constant dense<0.000000e+00> : vector<2x64xf32>
    %81 = tpu.matmul %69, %11, %cst_47 {dimension_numbers = #tpu.dot_dimension_numbers<[1], [0], [0], [1], [0, 0, 1, 1], [], []>} : vector<2x64xf32>, vector<64x64xf32>, vector<2x64xf32> -> vector<2x64xf32>
    %82 = arith.addf %80, %81 : vector<2x64xf32>
    %83 = math.tanh %82 : vector<2x64xf32>
    %84 = tpu.concatenate %83, %73 in 1 : vector<2x64xf32>, vector<2x64xf32> -> vector<2x128xf32>
    %cst_48 = arith.constant dense<0.000000e+00> : vector<2x64xf32>
    %85 = tpu.matmul %84, %12, %cst_48 {dimension_numbers = #tpu.dot_dimension_numbers<[1], [0], [0], [1], [0, 0, 1, 1], [], []>} : vector<2x128xf32>, vector<128x64xf32>, vector<2x64xf32> -> vector<2x64xf32>
    %86 = arith.addf %85, %15 : vector<2x64xf32>
    %87 = math.tanh %86 : vector<2x64xf32>
    %c5_i32 = arith.constant 5 : i32
    %c0_i32_49 = arith.constant 0 : i32
    %88 = arith.addi %c0_i32_49, %c5_i32 : i32
    %89 = arith.index_cast %88 : i32 to index
    %c0_50 = arith.constant 0 : index
    %90 = vector.load %arg12[%89, %c0_50] : memref<16x64xf32, #tpu.memory_space<vmem>>, vector<1x64xf32>
    %c8_i32_51 = arith.constant 8 : i32
    %91 = arith.addi %c8_i32_51, %c5_i32 : i32
    %92 = arith.index_cast %91 : i32 to index
    %c0_52 = arith.constant 0 : index
    %93 = vector.load %arg12[%92, %c0_52] : memref<16x64xf32, #tpu.memory_space<vmem>>, vector<1x64xf32>
    %94 = tpu.concatenate %90, %93 in 0 : vector<1x64xf32>, vector<1x64xf32> -> vector<2x64xf32>
    %cst_53 = arith.constant dense<0.000000e+00> : vector<2x64xf32>
    %95 = tpu.matmul %83, %11, %cst_53 {dimension_numbers = #tpu.dot_dimension_numbers<[1], [0], [0], [1], [0, 0, 1, 1], [], []>} : vector<2x64xf32>, vector<64x64xf32>, vector<2x64xf32> -> vector<2x64xf32>
    %96 = arith.addf %94, %95 : vector<2x64xf32>
    %97 = math.tanh %96 : vector<2x64xf32>
    %98 = tpu.concatenate %97, %87 in 1 : vector<2x64xf32>, vector<2x64xf32> -> vector<2x128xf32>
    %cst_54 = arith.constant dense<0.000000e+00> : vector<2x64xf32>
    %99 = tpu.matmul %98, %12, %cst_54 {dimension_numbers = #tpu.dot_dimension_numbers<[1], [0], [0], [1], [0, 0, 1, 1], [], []>} : vector<2x128xf32>, vector<128x64xf32>, vector<2x64xf32> -> vector<2x64xf32>
    %100 = arith.addf %99, %15 : vector<2x64xf32>
    %101 = math.tanh %100 : vector<2x64xf32>
    %c6_i32 = arith.constant 6 : i32
    %c0_i32_55 = arith.constant 0 : i32
    %102 = arith.addi %c0_i32_55, %c6_i32 : i32
    %103 = arith.index_cast %102 : i32 to index
    %c0_56 = arith.constant 0 : index
    %104 = vector.load %arg12[%103, %c0_56] : memref<16x64xf32, #tpu.memory_space<vmem>>, vector<1x64xf32>
    %c8_i32_57 = arith.constant 8 : i32
    %105 = arith.addi %c8_i32_57, %c6_i32 : i32
    %106 = arith.index_cast %105 : i32 to index
    %c0_58 = arith.constant 0 : index
    %107 = vector.load %arg12[%106, %c0_58] : memref<16x64xf32, #tpu.memory_space<vmem>>, vector<1x64xf32>
    %108 = tpu.concatenate %104, %107 in 0 : vector<1x64xf32>, vector<1x64xf32> -> vector<2x64xf32>
    %cst_59 = arith.constant dense<0.000000e+00> : vector<2x64xf32>
    %109 = tpu.matmul %97, %11, %cst_59 {dimension_numbers = #tpu.dot_dimension_numbers<[1], [0], [0], [1], [0, 0, 1, 1], [], []>} : vector<2x64xf32>, vector<64x64xf32>, vector<2x64xf32> -> vector<2x64xf32>
    %110 = arith.addf %108, %109 : vector<2x64xf32>
    %111 = math.tanh %110 : vector<2x64xf32>
    %112 = tpu.concatenate %111, %101 in 1 : vector<2x64xf32>, vector<2x64xf32> -> vector<2x128xf32>
    %cst_60 = arith.constant dense<0.000000e+00> : vector<2x64xf32>
    %113 = tpu.matmul %112, %12, %cst_60 {dimension_numbers = #tpu.dot_dimension_numbers<[1], [0], [0], [1], [0, 0, 1, 1], [], []>} : vector<2x128xf32>, vector<128x64xf32>, vector<2x64xf32> -> vector<2x64xf32>
    %114 = arith.addf %113, %15 : vector<2x64xf32>
    %115 = math.tanh %114 : vector<2x64xf32>
    %c7_i32 = arith.constant 7 : i32
    %c0_i32_61 = arith.constant 0 : i32
    %116 = arith.addi %c0_i32_61, %c7_i32 : i32
    %117 = arith.index_cast %116 : i32 to index
    %c0_62 = arith.constant 0 : index
    %118 = vector.load %arg12[%117, %c0_62] : memref<16x64xf32, #tpu.memory_space<vmem>>, vector<1x64xf32>
    %c8_i32_63 = arith.constant 8 : i32
    %119 = arith.addi %c8_i32_63, %c7_i32 : i32
    %120 = arith.index_cast %119 : i32 to index
    %c0_64 = arith.constant 0 : index
    %121 = vector.load %arg12[%120, %c0_64] : memref<16x64xf32, #tpu.memory_space<vmem>>, vector<1x64xf32>
    %122 = tpu.concatenate %118, %121 in 0 : vector<1x64xf32>, vector<1x64xf32> -> vector<2x64xf32>
    %cst_65 = arith.constant dense<0.000000e+00> : vector<2x64xf32>
    %123 = tpu.matmul %111, %11, %cst_65 {dimension_numbers = #tpu.dot_dimension_numbers<[1], [0], [0], [1], [0, 0, 1, 1], [], []>} : vector<2x64xf32>, vector<64x64xf32>, vector<2x64xf32> -> vector<2x64xf32>
    %124 = arith.addf %122, %123 : vector<2x64xf32>
    %125 = math.tanh %124 : vector<2x64xf32>
    %126 = tpu.concatenate %125, %115 in 1 : vector<2x64xf32>, vector<2x64xf32> -> vector<2x128xf32>
    %cst_66 = arith.constant dense<0.000000e+00> : vector<2x64xf32>
    %127 = tpu.matmul %126, %12, %cst_66 {dimension_numbers = #tpu.dot_dimension_numbers<[1], [0], [0], [1], [0, 0, 1, 1], [], []>} : vector<2x128xf32>, vector<128x64xf32>, vector<2x64xf32> -> vector<2x64xf32>
    %128 = arith.addf %127, %15 : vector<2x64xf32>
    %129 = math.tanh %128 : vector<2x64xf32>
    %c8_i32_67 = arith.constant 8 : i32
    %c0_68 = arith.constant 0 : index
    %c0_69 = arith.constant 0 : index
    %130 = vector.load %arg10[%c0_68, %c0_69] : memref<2x64xf32, #tpu.memory_space<vmem>>, vector<2x64xf32>
    tpu.vector_store %arg10[%c0_68, %c0_69], %125 {strides = array<i32>} : memref<2x64xf32, #tpu.memory_space<vmem>>, vector<2x64xf32>,
    %c0_70 = arith.constant 0 : index
    %c0_71 = arith.constant 0 : index
    %131 = vector.load %arg11[%c0_70, %c0_71] : memref<2x64xf32, #tpu.memory_space<vmem>>, vector<2x64xf32>
    tpu.vector_store %arg11[%c0_70, %c0_71], %129 {strides = array<i32>} : memref<2x64xf32, #tpu.memory_space<vmem>>, vector<2x64xf32>,
    %c0_i32_72 = arith.constant 0 : i32
    %132 = arith.cmpi eq, %arg0, %c0_i32_72 : i32
    %133 = arith.extui %132 : i1 to i32
    %c0_i32_73 = arith.constant 0 : i32
    %134 = arith.cmpi ne, %133, %c0_i32_73 : i32
    scf.if %134 {
      %cst_74 = arith.constant 0.000000e+00 : f32
      %135 = vector.broadcast %cst_74 : f32 to vector<2x64xf32>
      %136 = arith.maximumf %129, %135 : vector<2x64xf32>
      %c0_75 = arith.constant 0 : index
      %c0_76 = arith.constant 0 : index
      %137 = vector.load %arg7[%c0_75, %c0_76] : memref<64x3xf32, #tpu.memory_space<vmem>>, vector<64x3xf32>
      %cst_77 = arith.constant dense<0.000000e+00> : vector<2x3xf32>
      %138 = tpu.matmul %136, %137, %cst_77 {dimension_numbers = #tpu.dot_dimension_numbers<[1], [0], [0], [1], [0, 0, 1, 1], [], []>} : vector<2x64xf32>, vector<64x3xf32>, vector<2x3xf32> -> vector<2x3xf32>
      %c0_78 = arith.constant 0 : index
      %c0_79 = arith.constant 0 : index
      %139 = vector.load %arg8[%c0_78, %c0_79] : memref<1x3xf32, #tpu.memory_space<vmem>>, vector<1x3xf32>
      %140 = vector.broadcast %139 : vector<1x3xf32> to vector<2x3xf32>
      %141 = arith.addf %138, %140 : vector<2x3xf32>
      %c0_80 = arith.constant 0 : index
      %c0_81 = arith.constant 0 : index
      %142 = vector.load %arg9[%c0_80, %c0_81] : memref<2x3xf32, #tpu.memory_space<vmem>>, vector<2x3xf32>
      tpu.vector_store %arg9[%c0_80, %c0_81], %141 {strides = array<i32>} : memref<2x3xf32, #tpu.memory_space<vmem>>, vector<2x3xf32>,
    } else {
    }
    return
  }
  func.func @transform_0(%arg0: i32) -> (i32, i32, i32) {
    %c0_i32 = arith.constant 0 : i32
    %c0_i32_0 = arith.constant 0 : i32
    %c0_i32_1 = arith.constant 0 : i32
    return %c0_i32, %arg0, %c0_i32_0 : i32, i32, i32
  }
  func.func @transform_1(%arg0: i32) -> (i32, i32) {
    %c0_i32 = arith.constant 0 : i32
    %c0_i32_0 = arith.constant 0 : i32
    %c0_i32_1 = arith.constant 0 : i32
    return %c0_i32, %c0_i32_0 : i32, i32
  }
  func.func @transform_2(%arg0: i32) -> (i32, i32) {
    %c0_i32 = arith.constant 0 : i32
    %c0_i32_0 = arith.constant 0 : i32
    %c0_i32_1 = arith.constant 0 : i32
    return %c0_i32, %c0_i32_0 : i32, i32
  }
  func.func @transform_3(%arg0: i32) -> (i32, i32) {
    %c0_i32 = arith.constant 0 : i32
    %c0_i32_0 = arith.constant 0 : i32
    %c0_i32_1 = arith.constant 0 : i32
    return %c0_i32, %c0_i32_0 : i32, i32
  }
  func.func @transform_4(%arg0: i32) -> (i32, i32) {
    %c0_i32 = arith.constant 0 : i32
    %c0_i32_0 = arith.constant 0 : i32
    %c0_i32_1 = arith.constant 0 : i32
    return %c0_i32, %c0_i32_0 : i32, i32
  }
  func.func @transform_5(%arg0: i32) -> (i32, i32) {
    %c0_i32 = arith.constant 0 : i32
    %c0_i32_0 = arith.constant 0 : i32
    %c0_i32_1 = arith.constant 0 : i32
    return %c0_i32, %c0_i32_0 : i32, i32
  }
  func.func @transform_6(%arg0: i32) -> (i32, i32) {
    %c0_i32 = arith.constant 0 : i32
    %c0_i32_0 = arith.constant 0 : i32
    %c0_i32_1 = arith.constant 0 : i32
    return %c0_i32, %c0_i32_0 : i32, i32
  }
  func.func @transform_7(%arg0: i32) -> (i32, i32) {
    %c0_i32 = arith.constant 0 : i32
    %c0_i32_0 = arith.constant 0 : i32
    %c0_i32_1 = arith.constant 0 : i32
    return %c0_i32, %c0_i32_0 : i32, i32
  }
  func.func @transform_8(%arg0: i32) -> (i32, i32) {
    %c0_i32 = arith.constant 0 : i32
    %c0_i32_0 = arith.constant 0 : i32
    %c0_i32_1 = arith.constant 0 : i32
    return %c0_i32, %c0_i32_0 : i32, i32
  }
}

</mosaic_0001>

<bundles_post_ra>
// kernel: rnn_classifier_forward.1
= control target key start
LH: loop header
LB: loop body
LE: loop exit
PB: predicated region body
PF: predicated region fallthrough
CT: control target
= control target key end

     0   :  { %v2453_v1 = vmov 0.0   ;;  %vm34_vm0 = vcmask 517120   ;;  %s3367_s0 = inlined_call_operand.vmem [shape: f32[2,8,448], index: 0, kind: input, shape index: {}]   ;;  %s3368_s1 = inlined_call_operand.vmem [shape: f32[448,64], index: 1, kind: input, shape index: {}]   ;;  %s3369_s2 = inlined_call_operand.vmem [shape: f32[64,64], index: 2, kind: input, shape index: {}]   ;;  %s3370_s3 = inlined_call_operand.vmem [shape: f32[1,64], index: 3, kind: input, shape index: {}]   ;;  %s3371_s4 = inlined_call_operand.vmem [shape: f32[128,64], index: 4, kind: input, shape index: {}]   ;;  %s3372_s5 = inlined_call_operand.vmem [shape: f32[1,64], index: 5, kind: input, shape index: {}]   ;;  %s3373_s6 = inlined_call_operand.vmem [shape: f32[64,3], index: 6, kind: input, shape index: {}]   ;;  %s3374_s7 = inlined_call_operand.vmem [shape: f32[1,3], index: 7, kind: input, shape index: {}]   ;;  %s3375_s8 = inlined_call_operand.hbm [shape: f32[2,3], index: 8, kind: output, shape index: {}]  }
   0x1   :  { %v92_v0 = vld [vmem:[%s3368_s1 + $0x178] sm:$0xff]  ;;  %190 = vmatprep.subr.mxu1 %v2453_v1  ;;  %v91_v2 = vld [vmem:[%s3368_s1 + $0x170] sm:$0xff]  ;;  %35 = vst.msk [vmem:[#allocation2] sm:$0x3] %vm34_vm0, %v2453_v1  ;;  %36 = vst.msk [vmem:[#allocation3] sm:$0x3] %vm34_vm0, %v2453_v1 }
   0x2   :  { %v76_v3 = vld [vmem:[%s3368_s1 + $0xf8] sm:$0xff]  ;;  %191 = vmatpush1.msra.mxu1 %v92_v0  ;;  %v75_v5 = vld [vmem:[%s3368_s1 + $0xf0] sm:$0xff]  ;;  %v90_v7 = vld [vmem:[%s3368_s1 + $0x168] sm:$0xff] }
   0x3   :  { %v60_v4 = vld [vmem:[%s3368_s1 + $0x78] sm:$0xff]  ;;  %1682 = vmatprep.subr.mxu0 %v76_v3  ;;  %v59_v6 = vld [vmem:[%s3368_s1 + $0x70] sm:$0xff]  ;;  %192 = vmatprep.subr.mxu1 %v2453_v1  ;;  %v74_v8 = vld [vmem:[%s3368_s1 + $0xe8] sm:$0xff] }
   0x4   :  { %1683 = vmatpush3.msra.mxu0 %v60_v4  ;;  %193 = vmatpush1.msra.mxu1 %v91_v2  ;;  %v58_v9 = vld [vmem:[%s3368_s1 + $0x68] sm:$0xff]  ;;  %v89_v10 = vld [vmem:[%s3368_s1 + $0x160] sm:$0xff]  ;;  %v88_v13 = vld [vmem:[%s3368_s1 + $0x158] sm:$0xff] }
   0x5   :  { %1684 = vmatprep.subr.mxu0 %v75_v5  ;;  %194 = vmatprep.subr.mxu1 %v2453_v1  ;;  %v73_v11 = vld [vmem:[%s3368_s1 + $0xe0] sm:$0xff]  ;;  %v72_v14 = vld [vmem:[%s3368_s1 + $0xd8] sm:$0xff]  ;;  %v87_v16 = vld [vmem:[%s3368_s1 + $0x150] sm:$0xff] }
   0x6   :  { %1685 = vmatpush3.msra.mxu0 %v59_v6  ;;  %195 = vmatpush1.msra.mxu1 %v90_v7  ;;  %v57_v12 = vld [vmem:[%s3368_s1 + $0x60] sm:$0xff]  ;;  %v56_v15 = vld [vmem:[%s3368_s1 + $0x58] sm:$0xff]  ;;  %v71_v17 = vld [vmem:[%s3368_s1 + $0xd0] sm:$0xff] }
   0x7   :  { %1686 = vmatprep.subr.mxu0 %v74_v8  ;;  %196 = vmatprep.subr.mxu1 %v2453_v1  ;;  %v55_v18 = vld [vmem:[%s3368_s1 + $0x50] sm:$0xff]  ;;  %v86_v19 = vld [vmem:[%s3368_s1 + $0x148] sm:$0xff]  ;;  %v85_v22 = vld [vmem:[%s3368_s1 + $0x140] sm:$0xff] }
   0x8   :  { %1687 = vmatpush3.msra.mxu0 %v58_v9  ;;  %197 = vmatpush1.msra.mxu1 %v89_v10  ;;  %v70_v20 = vld [vmem:[%s3368_s1 + $0xc8] sm:$0xff]  ;;  %v69_v23 = vld [vmem:[%s3368_s1 + $0xc0] sm:$0xff]  ;;  %v84_v25 = vld [vmem:[%s3368_s1 + $0x138] sm:$0xff] }
   0x9   :  { %1688 = vmatprep.subr.mxu0 %v73_v11  ;;  %198 = vmatprep.subr.mxu1 %v2453_v1  ;;  %v54_v21 = vld [vmem:[%s3368_s1 + $0x48] sm:$0xff]  ;;  %v53_v24 = vld [vmem:[%s3368_s1 + $0x40] sm:$0xff]  ;;  %v68_v26 = vld [vmem:[%s3368_s1 + $0xb8] sm:$0xff] }
   0xa   :  { %1689 = vmatpush3.msra.mxu0 %v57_v12  ;;  %199 = vmatpush1.msra.mxu1 %v88_v13  ;;  %v52_v27 = vld [vmem:[%s3368_s1 + $0x38] sm:$0xff]  ;;  %v83_v28 = vld [vmem:[%s3368_s1 + $0x130] sm:$0xff]  ;;  %v82_v31 = vld [vmem:[%s3368_s1 + $0x128] sm:$0xff] }
   0xb   :  { %1690 = vmatprep.subr.mxu0 %v72_v14  ;;  %200 = vmatprep.subr.mxu1 %v2453_v1  ;;  %v67_v29 = vld [vmem:[%s3368_s1 + $0xb0] sm:$0xff]  ;;  %v66_v32 = vld [vmem:[%s3368_s1 + $0xa8] sm:$0xff]  ;;  %v81_v34 = vld [vmem:[%s3368_s1 + $0x120] sm:$0xff] }
   0xc   :  { %1691 = vmatpush3.msra.mxu0 %v56_v15  ;;  %201 = vmatpush1.msra.mxu1 %v87_v16  ;;  %v51_v30 = vld [vmem:[%s3368_s1 + $0x30] sm:$0xff]  ;;  %v50_v33 = vld [vmem:[%s3368_s1 + $0x28] sm:$0xff]  ;;  %v65_v35 = vld [vmem:[%s3368_s1 + $0xa0] sm:$0xff] }
   0xd   :  { %1692 = vmatprep.subr.mxu0 %v71_v17  ;;  %202 = vmatprep.subr.mxu1 %v2453_v1  ;;  %v49_v36 = vld [vmem:[%s3368_s1 + $0x20] sm:$0xff]  ;;  %v80_v37 = vld [vmem:[%s3368_s1 + $0x118] sm:$0xff] }
   0xe   :  { %1693 = vmatpush3.msra.mxu0 %v55_v18  ;;  %203 = vmatpush1.msra.mxu1 %v86_v19  ;;  %v64_v38 = vld [vmem:[%s3368_s1 + $0x98] sm:$0xff] }
   0xf   :  { %1694 = vmatprep.subr.mxu0 %v70_v20  ;;  %204 = vmatprep.subr.mxu1 %v2453_v1  ;;  %v48_v39 = vld [vmem:[%s3368_s1 + $0x18] sm:$0xff] }
  0x10   :  { %1695 = vmatpush3.msra.mxu0 %v54_v21  ;;  %205 = vmatpush1.msra.mxu1 %v85_v22 }
  0x11   :  { %1696 = vmatprep.subr.mxu0 %v69_v23  ;;  %206 = vmatprep.subr.mxu1 %v2453_v1 }
  0x12   :  { %1697 = vmatpush3.msra.mxu0 %v53_v24  ;;  %207 = vmatpush1.msra.mxu1 %v84_v25 }
  0x13   :  { %1698 = vmatprep.subr.mxu0 %v68_v26  ;;  %208 = vmatprep.subr.mxu1 %v2453_v1 }
  0x14   :  { %1699 = vmatpush3.msra.mxu0 %v52_v27  ;;  %209 = vmatpush1.msra.mxu1 %v83_v28 }
  0x15   :  { %1700 = vmatprep.subr.mxu0 %v67_v29  ;;  %210 = vmatprep.subr.mxu1 %v2453_v1 }
  0x16   :  { %1701 = vmatpush3.msra.mxu0 %v51_v30  ;;  %211 = vmatpush1.msra.mxu1 %v82_v31 }
  0x17   :  { %1702 = vmatprep.subr.mxu0 %v66_v32  ;;  %212 = vmatprep.subr.mxu1 %v2453_v1 }
  0x18   :  { %1703 = vmatpush3.msra.mxu0 %v50_v33  ;;  %213 = vmatpush1.msra.mxu1 %v81_v34 }
  0x19   :  { %1704 = vmatprep.subr.mxu0 %v65_v35 }
  0x1a   :  { %13 = vsyncpa [#allocation6], 0  ;;  %214 = vmatprep.subr.mxu1 %v2453_v1  ;;  %v79_v40 = vld [vmem:[%s3368_s1 + $0x110] sm:$0xff]  ;;  %1705 = vmatpush3.msra.mxu0 %v49_v36  ;;  %v78_v43 = vld [vmem:[%s3368_s1 + $0x108] sm:$0xff]  ;;  %vm108_vm1 = vcmask 523264   ;;  %vm2454_vm2 = vmmov 0  }
  0x1b   :  { %v63_v41 = vld [vmem:[%s3368_s1 + $0x90] sm:$0xff]  ;;  %215 = vmatpush1.msra.mxu1 %v80_v37  ;;  %1706 = vmatprep.subr.mxu0 %v64_v38  ;;  %v62_v44 = vld [vmem:[%s3368_s1 + $0x88] sm:$0xff]  ;;  %v77_v46 = vld [vmem:[%s3368_s1 + $0x100] sm:$0xff]  ;;  %s2455_s16 = smov 64   ;;  %vm305_vm3 = vcmask 1040384   ;;  %vm1652_vm4 = vcmask 17408  }
  0x1c   :  { %v47_v42 = vld [vmem:[%s3368_s1 + $0x10] sm:$0xff]  ;;  %216 = vmatprep.subr.mxu1 %v2453_v1  ;;  %1707 = vmatpush3.msra.mxu0 %v48_v39  ;;  %v46_v45 = vld [vmem:[%s3368_s1 + $0x8] sm:$0xff]  ;;  %v61_v47 = vld [vmem:[%s3368_s1 + $0x80] sm:$0xff] }
  0x1d   :  { %217 = vmatpush1.msra.mxu1 %v79_v40  ;;  %1708 = vmatprep.subr.mxu0 %v63_v41  ;;  %v45_v48 = vld [vmem:[%s3368_s1] sm:$0xff]  ;;  %v100_v49 = vld [vmem:[%s3368_s1 + $0x1b8] sm:$0xff]  ;;  %v38_v50 = vld [vmem:[%s3367_s0 + $0x8] sm:$0xff] }
  0x1e   :  { %218 = vmatprep.subr.mxu1 %v2453_v1  ;;  %1709 = vmatpush3.msra.mxu0 %v47_v42  ;;  %v37_v51 = vld [vmem:[%s3367_s0] sm:$0xff]  ;;  %v99_v52 = vld [vmem:[%s3368_s1 + $0x1b0] sm:$0xff]  ;;  %v42_v53 = vld [vmem:[%s3367_s0 + $0x28] sm:$0xff] }
  0x1f   :  { %219 = vmatpush1.msra.mxu1 %v78_v43  ;;  %1710 = vmatprep.subr.mxu0 %v62_v44  ;;  %v40_v54 = vld [vmem:[%s3367_s0 + $0x18] sm:$0xff]  ;;  %v98_v55 = vld [vmem:[%s3368_s1 + $0x1a8] sm:$0xff]  ;;  %v41_v56 = vld [vmem:[%s3367_s0 + $0x20] sm:$0xff] }
  0x20   :  { %220 = vmatprep.subr.mxu1 %v2453_v1  ;;  %1711 = vmatpush3.msra.mxu0 %v46_v45  ;;  %v97_v57 = vld [vmem:[%s3368_s1 + $0x1a0] sm:$0xff]  ;;  %v2700_v58 = vld [vmem:[%s3369_s2 + $0x38] sm:$0xff]  ;;  %v2710_v60 = vld [vmem:[%s3369_s2 + $0x30] sm:$0xff] }
  0x21   :  { %221 = vmatpush1.msra.mxu1 %v77_v46  ;;  %1712 = vmatprep.subr.mxu0 %v61_v47  ;;  %v96_v59 = vld [vmem:[%s3368_s1 + $0x198] sm:$0xff]  ;;  %v95_v61 = vld [vmem:[%s3368_s1 + $0x190] sm:$0xff]  ;;  %v2721_v62 = vld [vmem:[%s3369_s2 + $0x28] sm:$0xff] }
  0x22   :  { %238 = vmatprep.subr.mxu1 %v2453_v1  ;;  %1713 = vmatpush3.msra.mxu0 %v45_v48  ;;  %v94_v63 = vld [vmem:[%s3368_s1 + $0x188] sm:$0xff]  ;;  %v2732_v0 = vld [vmem:[%s3369_s2 + $0x20] sm:$0xff]  ;;  %v2743_v3 = vld [vmem:[%s3369_s2 + $0x18] sm:$0xff] }
  0x23   :  { %239 = vmatpush2.msra.mxu1 %v100_v49  ;;  %179 = vmatprep.mubr.f32.mxu0 %v38_v50  ;;  %v93_v2 = vld [vmem:[%s3368_s1 + $0x180] sm:$0xff]  ;;  %v39_v4 = vld [vmem:[%s3367_s0 + $0x10] sm:$0xff]  ;;  %v44_v5 = vld [vmem:[%s3367_s0 + $0x38] sm:$0xff] }
  0x24   :  { %240 = vmatprep.subr.mxu1 %v2453_v1  ;;  %180 = vmatmul.mubr.f32.vlgmr.msra.gmra.mxu0 %v37_v51  ;;  %v2757_v6 = vld [vmem:[%s3369_s2 + $0x10] sm:$0xff]  ;;  %v2764_v7 = vld [vmem:[%s3369_s2 + $0x8] sm:$0xff]  ;;  %v299_v8 = vld [vmem:[#allocation3] sm:$0x3] }
  0x25   :  { %241 = vmatpush2.msra.mxu1 %v99_v52  ;;  %184 = vmatprep.mubr.f32.mxu0 %v42_v53  ;;  %v43_v9 = vld [vmem:[%s3367_s0 + $0x30] sm:$0xff]  ;;  %v2775_v10 = vld [vmem:[%s3369_s2] sm:$0xff]  ;;  %v2809_v12 = vld [vmem:[%s3371_s4 + $0x78] sm:$0xff] }
  0x26   :  { %242 = vmatprep.subr.mxu1 %v2453_v1  ;;  %1669 = vmatprep.mubr.msk.f32.mxu1 %vm108_vm1, %v40_v54  ;;  %v298_v11 = vld [vmem:[#allocation2] sm:$0x3]  ;;  %v2816_v13 = vld [vmem:[%s3371_s4 + $0x70] sm:$0xff]  ;;  %v2823_v14 = vld [vmem:[%s3371_s4 + $0x68] sm:$0xff] }
  0x27   :  { %243 = vmatpush2.msra.mxu1 %v98_v55  ;;  %1937 = vmatprep.subr.mxu0 %v2453_v1  ;;  %v2828_v15 = vld [vmem:[%s3371_s4 + $0x60] sm:$0xff]  ;;  %v2835_v16 = vld [vmem:[%s3371_s4 + $0x58] sm:$0xff]  ;;  %v2842_v17 = vld [vmem:[%s3371_s4 + $0x50] sm:$0xff] }
  0x28   :  { %244 = vmatprep.subr.mxu1 %v2453_v1  ;;  %185 = vmatmul.mubr.f32.gmra.mxu0 %v41_v56  ;;  %v2851_v18 = vld [vmem:[%s3371_s4 + $0x48] sm:$0xff]  ;;  %v2858_v19 = vld [vmem:[%s3371_s4 + $0x40] sm:$0xff]  ;;  %v2865_v20 = vld [vmem:[%s3371_s4 + $0x38] sm:$0xff] }
  0x29   :  { %245 = vmatpush2.msra.mxu1 %v97_v57  ;;  %1938 = vmatpush3.msra.mxu0 %v2700_v58  ;;  %v2871_v21 = vld [vmem:[%s3371_s4 + $0x30] sm:$0xff]  ;;  %v2877_v22 = vld [vmem:[%s3371_s4 + $0x28] sm:$0xff]  ;;  %v2884_v23 = vld [vmem:[%s3371_s4 + $0x20] sm:$0xff] }
  0x2a   :  { %246 = vmatprep.subr.mxu1 %v2453_v1  ;;  %1939 = vmatprep.subr.mxu0 %v2453_v1  ;;  %v2891_v24 = vld [vmem:[%s3371_s4 + $0x18] sm:$0xff]  ;;  %v2898_v25 = vld [vmem:[%s3371_s4 + $0x10] sm:$0xff]  ;;  %v2905_v26 = vld [vmem:[%s3371_s4 + $0x8] sm:$0xff] }
  0x2b   :  { %247 = vmatpush2.msra.mxu1 %v96_v59  ;;  %1940 = vmatpush3.msra.mxu0 %v2710_v60  ;;  %v2914_v27 = vld [vmem:[%s3371_s4] sm:$0xff] }
  0x2c   :  { %248 = vmatprep.subr.mxu1 %v2453_v1  ;;  %1941 = vmatprep.subr.mxu0 %v2453_v1  ;;  %v1668_v33 = vld [vmem:[%s3370_s3] ss:$0 sm:$0xff] }
  0x2d   :  { %249 = vmatpush2.msra.mxu1 %v95_v61  ;;  %1942 = vmatpush3.msra.mxu0 %v2721_v62  ;;  %v2981_v56 = vld [vmem:[%s3372_s5] ss:$0 sm:$0xff] }
  0x2e   :  { %250 = vmatprep.subr.mxu1 %v2453_v1  ;;  %1943 = vmatprep.subr.mxu0 %v2453_v1 }
  0x2f   :  { %251 = vmatpush2.msra.mxu1 %v94_v63  ;;  %1944 = vmatpush3.msra.mxu0 %v2732_v0 }
  0x30   :  { %252 = vmatprep.subr.mxu1 %v2453_v1  ;;  %1945 = vmatprep.subr.mxu0 %v2453_v1 }
  0x31   :  { %253 = vmatpush2.msra.mxu1 %v93_v2  ;;  %1946 = vmatpush3.msra.mxu0 %v2743_v3 }
  0x32   :  { %255 = vmatmul.mubr.f32.vlgmr.msra.gmra.mxu1 %v39_v4  ;;  %1947 = vmatprep.subr.mxu0 %v2453_v1 }
  0x33   :  { %1670 = vmatprep.mubr.msk.f32.mxu1 %vm108_vm1, %v44_v5  ;;  %1948 = vmatpush3.msra.mxu0 %v2757_v6 }
  0x34   :  { %1949 = vmatprep.subr.mxu0 %v2453_v1  ;;  %1953 = vmatprep.mubr.msk.f32.mxu0 %vm2454_vm2, %v2453_v1 }
  0x35   :  { %1950 = vmatpush3.msra.mxu0 %v2764_v7  ;;  %383 = vrot.lane.b32.xlu0 %v299_v8, %s2455_s16 }
  0x36   :  { %260 = vmatmul.mubr.f32.gmra.mxu1 %v43_v9  ;;  %1951 = vmatprep.subr.mxu0 %v2453_v1 }
  0x37   :  { %1952 = vmatpush3.msra.mxu0 %v2775_v10  ;;  %1991 = vmatprep.subr.mxu1 %v2453_v1 }
  0x38   :  { %1954 = vmatmul.mubr.msk.f32.vlgmr.msra.gmra.mxu0 %vm108_vm1, %v298_v11  ;;  %1956 = vmatprep.subr.mxu0 %v2453_v1 }
  0x39   :  { %1992 = vmatpush3.msra.mxu1 %v2700_v58  ;;  %2007 = vmatprep.mubr.msk.f32.mxu1 %vm2454_vm2, %v2453_v1 }
  0x3a   :  { %1993 = vmatprep.subr.mxu1 %v2453_v1  ;;  %1988 = vmatprep.mubr.msk.f32.mxu0 %vm2454_vm2, %v2453_v1 }
  0x3b   :  { %1994 = vmatpush3.msra.mxu1 %v2710_v60  ;;  %1957 = vmatpush3.msra.mxu0 %v2809_v12 }
  0x3c   :  { %1995 = vmatprep.subr.mxu1 %v2453_v1  ;;  %1958 = vmatprep.subr.mxu0 %v2453_v1 }
  0x3d   :  { %1996 = vmatpush3.msra.mxu1 %v2721_v62  ;;  %1959 = vmatpush3.msra.mxu0 %v2816_v13 }
  0x3e   :  { %1997 = vmatprep.subr.mxu1 %v2453_v1  ;;  %1960 = vmatprep.subr.mxu0 %v2453_v1 }
  0x3f   :  { %1998 = vmatpush3.msra.mxu1 %v2732_v0  ;;  %1961 = vmatpush3.msra.mxu0 %v2823_v14 }
  0x40   :  { %1999 = vmatprep.subr.mxu1 %v2453_v1  ;;  %1962 = vmatprep.subr.mxu0 %v2453_v1 }
  0x41   :  { %2000 = vmatpush3.msra.mxu1 %v2743_v3  ;;  %1963 = vmatpush3.msra.mxu0 %v2828_v15 }
  0x42   :  { %2001 = vmatprep.subr.mxu1 %v2453_v1  ;;  %1964 = vmatprep.subr.mxu0 %v2453_v1 }
  0x43   :  { %2002 = vmatpush3.msra.mxu1 %v2757_v6  ;;  %1965 = vmatpush3.msra.mxu0 %v2835_v16 }
  0x44   :  { %2003 = vmatprep.subr.mxu1 %v2453_v1  ;;  %1966 = vmatprep.subr.mxu0 %v2453_v1 }
  0x45   :  { %2004 = vmatpush3.msra.mxu1 %v2764_v7  ;;  %1967 = vmatpush3.msra.mxu0 %v2842_v17 }
  0x46   :  { %2005 = vmatprep.subr.mxu1 %v2453_v1  ;;  %1968 = vmatprep.subr.mxu0 %v2453_v1 }
  0x47   :  { %2006 = vmatpush3.msra.mxu1 %v2775_v10  ;;  %1969 = vmatpush3.msra.mxu0 %v2851_v18 }
  0x48   :  { %2010 = vmatprep.subr.mxu1 %v2453_v1  ;;  %1970 = vmatprep.subr.mxu0 %v2453_v1 }
  0x49   :  { %1971 = vmatpush3.msra.mxu0 %v2858_v19 }
  0x4a   :  { %1972 = vmatprep.subr.mxu0 %v2453_v1 }
  0x4b   :  { %1973 = vmatpush3.msra.mxu0 %v2865_v20 }
  0x4c   :  { %1974 = vmatprep.subr.mxu0 %v2453_v1 }
  0x4d   :  { %1975 = vmatpush3.msra.mxu0 %v2871_v21 }
  0x4e   :  { %1976 = vmatprep.subr.mxu0 %v2453_v1 }
  0x4f   :  { %1977 = vmatpush3.msra.mxu0 %v2877_v22 }
  0x50   :  { %1978 = vmatprep.subr.mxu0 %v2453_v1 }
  0x51   :  { %1979 = vmatpush3.msra.mxu0 %v2884_v23 }
  0x52   :  { %1980 = vmatprep.subr.mxu0 %v2453_v1 }
  0x53   :  { %1981 = vmatpush3.msra.mxu0 %v2891_v24 }
  0x54   :  { %1982 = vmatprep.subr.mxu0 %v2453_v1 }
  0x55   :  { %1983 = vmatpush3.msra.mxu0 %v2898_v25 }
  0x56   :  { %1984 = vmatprep.subr.mxu0 %v2453_v1 }
  0x57   :  { %1985 = vmatpush3.msra.mxu0 %v2905_v26 }
  0x58   :  { %1986 = vmatprep.subr.mxu0 %v2453_v1 }
  0x59   :  { %1987 = vmatpush3.msra.mxu0 %v2914_v27 }
  0x5a   :  { %2045 = vmatprep.subr.mxu0 %v2453_v1 }
  0xa7   :  { %v384_v50 = vpop.permute.xlu0 %383 }
  0xe4   :  { %v1714_v28 = vpop.f32.mrf.mxu0 }
  0xe6   :  { %v1715_v29 = vpop.f32.mrf.mxu0 }
  0xe7   :  { %v1716_v31 = vadd.f32 %v1715_v29, %v1714_v28 }
  0xe8   :  { %v1717_v30 = vpop.f32.mrf.mxu0 }
  0xe9   :  { %v182_v35 = vadd.f32 %v1716_v31, %v1668_v33 }
  0xea   :  { %v1718_v32 = vpop.f32.mrf.mxu0 }
  0xeb   :  { %v1719_v34 = vadd.f32 %v1718_v32, %v1717_v30 }
  0xed   :  { %v187_v39 = vadd.f32 %v1719_v34, %v1668_v33 }
  0xf2   :  { %v256_v36 = vpop.f32.mrf.mxu1 }
  0xf3   :  { %v257_v37 = vadd.f32 %v256_v36, %v182_v35 }
  0xf4   :  { %v258_v38 = vpop.f32.mrf.mxu1 }
  0xf5   :  { %265 = vst.msk [vmem:[#allocation4] sm:$0xff] %vm108_vm1, %v257_v37 }
  0xf6   :  { %v261_v40 = vpop.f32.mrf.mxu1 }
  0xf7   :  { %v262_v41 = vadd.f32 %v261_v40, %v187_v39 }
  0xf8   :  { %v263_v42 = vpop.f32.mrf.mxu1  ;;  %v376_v43 = vpop.f32.mrf.mxu0 }
  0xf9   :  { %266 = vst.msk [vmem:[#allocation4 + $0x8] sm:$0xff] %vm108_vm1, %v262_v41 }
  0xfa   :  { %v1955_v44 = vpop.f32.mrf.mxu0 }
  0xfc   :  { %v300_v47 = vld [vmem:[#allocation4] sm:$0x1]  ;;  %v458_v55 = vld [vmem:[#allocation4 + $0x1] sm:$0x1]  ;;  %v615_v31 = vld [vmem:[#allocation4 + $0x2] sm:$0x1] }
 0x100   :  { %v301_v45 = vld [vmem:[#allocation4 + $0x8] sm:$0x1]  ;;  %v459_v53 = vld [vmem:[#allocation4 + $0x9] sm:$0x1]  ;;  %v616_v29 = vld [vmem:[#allocation4 + $0xa] sm:$0x1] }
 0x101   :  { %v303_v46 = vrot.slane %v301_v45, 7  ;;  %v461_v54 = vrot.slane %v459_v53, 7  ;;  %v618_v30 = vrot.slane %v616_v29, 7  ;;  %v772_v45 = vld [vmem:[#allocation4 + $0x3] sm:$0x1] }
 0x103   :  { %v306_v48 = vsel %vm305_vm3, %v300_v47, %v303_v46  ;;  %v463_v57 = vsel %vm305_vm3, %v458_v55, %v461_v54  ;;  %v620_v32 = vsel %vm305_vm3, %v615_v31, %v618_v30  ;;  %v930_v54 = vld [vmem:[#allocation4 + $0xc] sm:$0x1]  ;;  %v1087_v30 = vld [vmem:[#allocation4 + $0xd] sm:$0x1] }
 0x104   :  { %v380_v49 = vadd.f32 %v376_v43, %v306_v48  ;;  %v773_v43 = vld [vmem:[#allocation4 + $0xb] sm:$0x1]  ;;  %v932_v55 = vrot.slane %v930_v54, 7  ;;  %v1089_v31 = vrot.slane %v1087_v30, 7 }
 0x105   :  { %v775_v44 = vrot.slane %v773_v43, 7 }
 0x106   :  { %2392 = vtanh.f32 %v380_v49 }
 0x107   :  { %v777_v46 = vsel %vm305_vm3, %v772_v45, %v775_v44 }
 0x113   :  { %v2393_v51 = vpop.eup %2392 }
 0x114   :  { %v386_v52 = vsel %vm108_vm1, %v2393_v51, %v384_v50  ;;  %2008 = vmatmul.mubr.msk.f32.vlgmr.msra.gmra.mxu1 %vm108_vm1, %v2393_v51 }
 0x115   :  { %1989 = vmatmul.mubr.f32.vlgmr.msra.gmra.mxu0 %v386_v52  ;;  %2011 = vmatpush3.msra.mxu1 %v2809_v12 }
 0x116   :  { %2046 = vmatpush3.msra.mxu0 %v2700_v58  ;;  %2061 = vmatprep.mubr.msk.f32.mxu0 %vm2454_vm2, %v2453_v1 }
 0x117   :  { %2047 = vmatprep.subr.mxu0 %v2453_v1  ;;  %2012 = vmatprep.subr.mxu1 %v2453_v1 }
 0x118   :  { %2048 = vmatpush3.msra.mxu0 %v2710_v60  ;;  %2013 = vmatpush3.msra.mxu1 %v2816_v13 }
 0x119   :  { %2049 = vmatprep.subr.mxu0 %v2453_v1  ;;  %2014 = vmatprep.subr.mxu1 %v2453_v1 }
 0x11a   :  { %2050 = vmatpush3.msra.mxu0 %v2721_v62  ;;  %2015 = vmatpush3.msra.mxu1 %v2823_v14 }
 0x11b   :  { %2051 = vmatprep.subr.mxu0 %v2453_v1  ;;  %2016 = vmatprep.subr.mxu1 %v2453_v1 }
 0x11c   :  { %2052 = vmatpush3.msra.mxu0 %v2732_v0  ;;  %2017 = vmatpush3.msra.mxu1 %v2828_v15 }
 0x11d   :  { %2053 = vmatprep.subr.mxu0 %v2453_v1  ;;  %2018 = vmatprep.subr.mxu1 %v2453_v1 }
 0x11e   :  { %2054 = vmatpush3.msra.mxu0 %v2743_v3  ;;  %2019 = vmatpush3.msra.mxu1 %v2835_v16 }
 0x11f   :  { %2055 = vmatprep.subr.mxu0 %v2453_v1  ;;  %2020 = vmatprep.subr.mxu1 %v2453_v1 }
 0x120   :  { %2056 = vmatpush3.msra.mxu0 %v2757_v6  ;;  %2021 = vmatpush3.msra.mxu1 %v2842_v17 }
 0x121   :  { %2057 = vmatprep.subr.mxu0 %v2453_v1  ;;  %2022 = vmatprep.subr.mxu1 %v2453_v1 }
 0x122   :  { %2058 = vmatpush3.msra.mxu0 %v2764_v7  ;;  %2023 = vmatpush3.msra.mxu1 %v2851_v18 }
 0x123   :  { %2059 = vmatprep.subr.mxu0 %v2453_v1  ;;  %2024 = vmatprep.subr.mxu1 %v2453_v1 }
 0x124   :  { %2060 = vmatpush3.msra.mxu0 %v2775_v10  ;;  %2025 = vmatpush3.msra.mxu1 %v2858_v19 }
 0x125   :  { %2026 = vmatprep.subr.mxu1 %v2453_v1  ;;  %2042 = vmatprep.mubr.msk.f32.mxu1 %vm2454_vm2, %v2453_v1 }
 0x126   :  { %2027 = vmatpush3.msra.mxu1 %v2865_v20  ;;  %2064 = vmatprep.subr.mxu0 %v2453_v1 }
 0x127   :  { %2028 = vmatprep.subr.mxu1 %v2453_v1 }
 0x128   :  { %2029 = vmatpush3.msra.mxu1 %v2871_v21 }
 0x129   :  { %2030 = vmatprep.subr.mxu1 %v2453_v1 }
 0x12a   :  { %2031 = vmatpush3.msra.mxu1 %v2877_v22 }
 0x12b   :  { %2032 = vmatprep.subr.mxu1 %v2453_v1 }
 0x12c   :  { %2033 = vmatpush3.msra.mxu1 %v2884_v23 }
 0x12d   :  { %2034 = vmatprep.subr.mxu1 %v2453_v1 }
 0x12e   :  { %2035 = vmatpush3.msra.mxu1 %v2891_v24 }
 0x12f   :  { %2036 = vmatprep.subr.mxu1 %v2453_v1 }
 0x130   :  { %2037 = vmatpush3.msra.mxu1 %v2898_v25 }
 0x131   :  { %2038 = vmatprep.subr.mxu1 %v2453_v1 }
 0x132   :  { %2039 = vmatpush3.msra.mxu1 %v2905_v26 }
 0x133   :  { %2040 = vmatprep.subr.mxu1 %v2453_v1 }
 0x134   :  { %2041 = vmatpush3.msra.mxu1 %v2914_v27 }
 0x135   :  { %2099 = vmatprep.subr.mxu1 %v2453_v1 }
 0x1d4   :  { %v533_v59 = vpop.f32.mrf.mxu1 }
 0x1d5   :  { %v537_v61 = vadd.f32 %v533_v59, %v463_v57  ;;  %v453_v63 = vpop.f32.mrf.mxu0  ;;  %v929_v57 = vld [vmem:[#allocation4 + $0x4] sm:$0x1] }
 0x1d6   :  { %v454_v2 = vadd.f32 %v2981_v56, %v453_v63  ;;  %v2009_v4 = vpop.f32.mrf.mxu1 }
 0x1d7   :  { %2394 = vtanh.f32 %v537_v61  ;;  %v1990_v5 = vpop.f32.mrf.mxu0  ;;  %v934_v61 = vsel %vm305_vm3, %v929_v57, %v932_v55 }
 0x1d8   :  { %2396 = vtanh.f32 %v454_v2 }
 0x1e4   :  { %v2395_v8 = vpop.eup %2394 }
 0x1e5   :  { %v2397_v9 = vpop.eup %2396  ;;  %2062 = vmatmul.mubr.msk.f32.vlgmr.msra.gmra.mxu0 %vm108_vm1, %v2395_v8 }
 0x1e6   :  { %540 = vrot.lane.b32.xlu0 %v2397_v9, %s2455_s16  ;;  %2065 = vmatpush3.msra.mxu0 %v2809_v12 }
 0x1e7   :  { %2066 = vmatprep.subr.mxu0 %v2453_v1  ;;  %2096 = vmatprep.mubr.msk.f32.mxu0 %vm2454_vm2, %v2453_v1 }
 0x1e8   :  { %2067 = vmatpush3.msra.mxu0 %v2816_v13 }
 0x1e9   :  { %2068 = vmatprep.subr.mxu0 %v2453_v1 }
 0x1ea   :  { %2069 = vmatpush3.msra.mxu0 %v2823_v14 }
 0x1eb   :  { %2070 = vmatprep.subr.mxu0 %v2453_v1 }
 0x1ec   :  { %2071 = vmatpush3.msra.mxu0 %v2828_v15 }
 0x1ed   :  { %2072 = vmatprep.subr.mxu0 %v2453_v1 }
 0x1ee   :  { %2073 = vmatpush3.msra.mxu0 %v2835_v16 }
 0x1ef   :  { %2074 = vmatprep.subr.mxu0 %v2453_v1 }
 0x1f0   :  { %2075 = vmatpush3.msra.mxu0 %v2842_v17 }
 0x1f1   :  { %2076 = vmatprep.subr.mxu0 %v2453_v1 }
 0x1f2   :  { %2077 = vmatpush3.msra.mxu0 %v2851_v18 }
 0x1f3   :  { %2078 = vmatprep.subr.mxu0 %v2453_v1 }
 0x1f4   :  { %2079 = vmatpush3.msra.mxu0 %v2858_v19 }
 0x1f5   :  { %2080 = vmatprep.subr.mxu0 %v2453_v1 }
 0x1f6   :  { %2081 = vmatpush3.msra.mxu0 %v2865_v20 }
 0x1f7   :  { %2082 = vmatprep.subr.mxu0 %v2453_v1 }
 0x1f8   :  { %2083 = vmatpush3.msra.mxu0 %v2871_v21 }
 0x1f9   :  { %2084 = vmatprep.subr.mxu0 %v2453_v1 }
 0x1fa   :  { %2085 = vmatpush3.msra.mxu0 %v2877_v22 }
 0x1fb   :  { %2086 = vmatprep.subr.mxu0 %v2453_v1 }
 0x1fc   :  { %2087 = vmatpush3.msra.mxu0 %v2884_v23 }
 0x1fd   :  { %2088 = vmatprep.subr.mxu0 %v2453_v1 }
 0x1fe   :  { %2089 = vmatpush3.msra.mxu0 %v2891_v24 }
 0x1ff   :  { %2090 = vmatprep.subr.mxu0 %v2453_v1 }
 0x200   :  { %2091 = vmatpush3.msra.mxu0 %v2898_v25 }
 0x201   :  { %2092 = vmatprep.subr.mxu0 %v2453_v1 }
 0x202   :  { %2093 = vmatpush3.msra.mxu0 %v2905_v26 }
 0x203   :  { %2094 = vmatprep.subr.mxu0 %v2453_v1 }
 0x204   :  { %2095 = vmatpush3.msra.mxu0 %v2914_v27 }
 0x205   :  { %2153 = vmatprep.subr.mxu0 %v2453_v1 }
 0x258   :  { %v541_v11 = vpop.permute.xlu0 %540 }
 0x259   :  { %v543_v28 = vsel %vm108_vm1, %v2395_v8, %v541_v11 }
 0x25a   :  { %2043 = vmatmul.mubr.f32.vlgmr.msra.gmra.mxu1 %v543_v28 }
 0x25b   :  { %2100 = vmatpush3.msra.mxu1 %v2700_v58  ;;  %2115 = vmatprep.mubr.msk.f32.mxu1 %vm2454_vm2, %v2453_v1 }
 0x25c   :  { %2101 = vmatprep.subr.mxu1 %v2453_v1 }
 0x25d   :  { %2102 = vmatpush3.msra.mxu1 %v2710_v60 }
 0x25e   :  { %2103 = vmatprep.subr.mxu1 %v2453_v1 }
 0x25f   :  { %2104 = vmatpush3.msra.mxu1 %v2721_v62 }
 0x260   :  { %2105 = vmatprep.subr.mxu1 %v2453_v1 }
 0x261   :  { %2106 = vmatpush3.msra.mxu1 %v2732_v0 }
 0x262   :  { %2107 = vmatprep.subr.mxu1 %v2453_v1 }
 0x263   :  { %2108 = vmatpush3.msra.mxu1 %v2743_v3 }
 0x264   :  { %2109 = vmatprep.subr.mxu1 %v2453_v1 }
 0x265   :  { %2110 = vmatpush3.msra.mxu1 %v2757_v6 }
 0x266   :  { %2111 = vmatprep.subr.mxu1 %v2453_v1 }
 0x267   :  { %2112 = vmatpush3.msra.mxu1 %v2764_v7 }
 0x268   :  { %2113 = vmatprep.subr.mxu1 %v2453_v1 }
 0x269   :  { %2114 = vmatpush3.msra.mxu1 %v2775_v10 }
 0x26a   :  { %2118 = vmatprep.subr.mxu1 %v2453_v1 }
 0x2a5   :  { %v690_v33 = vpop.f32.mrf.mxu0 }
 0x2a6   :  { %v694_v34 = vadd.f32 %v690_v33, %v620_v32  ;;  %v1086_v32 = vld [vmem:[#allocation4 + $0x5] sm:$0x1] }
 0x2a7   :  { %v2063_v35 = vpop.f32.mrf.mxu0 }
 0x2a8   :  { %2398 = vtanh.f32 %v694_v34  ;;  %v1091_v34 = vsel %vm305_vm3, %v1086_v32, %v1089_v31 }
 0x2b5   :  { %v2399_v36 = vpop.eup %2398 }
 0x2b6   :  { %2116 = vmatmul.mubr.msk.f32.vlgmr.msra.gmra.mxu1 %vm108_vm1, %v2399_v36 }
 0x2b7   :  { %2119 = vmatpush3.msra.mxu1 %v2809_v12  ;;  %2150 = vmatprep.mubr.msk.f32.mxu1 %vm2454_vm2, %v2453_v1 }
 0x2b8   :  { %2120 = vmatprep.subr.mxu1 %v2453_v1 }
 0x2b9   :  { %2121 = vmatpush3.msra.mxu1 %v2816_v13 }
 0x2ba   :  { %2122 = vmatprep.subr.mxu1 %v2453_v1 }
 0x2bb   :  { %2123 = vmatpush3.msra.mxu1 %v2823_v14 }
 0x2bc   :  { %2124 = vmatprep.subr.mxu1 %v2453_v1 }
 0x2bd   :  { %2125 = vmatpush3.msra.mxu1 %v2828_v15 }
 0x2be   :  { %2126 = vmatprep.subr.mxu1 %v2453_v1 }
 0x2bf   :  { %2127 = vmatpush3.msra.mxu1 %v2835_v16 }
 0x2c0   :  { %2128 = vmatprep.subr.mxu1 %v2453_v1 }
 0x2c1   :  { %2129 = vmatpush3.msra.mxu1 %v2842_v17 }
 0x2c2   :  { %2130 = vmatprep.subr.mxu1 %v2453_v1 }
 0x2c3   :  { %2131 = vmatpush3.msra.mxu1 %v2851_v18 }
 0x2c4   :  { %2132 = vmatprep.subr.mxu1 %v2453_v1 }
 0x2c5   :  { %2133 = vmatpush3.msra.mxu1 %v2858_v19 }
 0x2c6   :  { %2134 = vmatprep.subr.mxu1 %v2453_v1 }
 0x2c7   :  { %2135 = vmatpush3.msra.mxu1 %v2865_v20 }
 0x2c8   :  { %2136 = vmatprep.subr.mxu1 %v2453_v1 }
 0x2c9   :  { %2137 = vmatpush3.msra.mxu1 %v2871_v21 }
 0x2ca   :  { %2138 = vmatprep.subr.mxu1 %v2453_v1 }
 0x2cb   :  { %2139 = vmatpush3.msra.mxu1 %v2877_v22 }
 0x2cc   :  { %2140 = vmatprep.subr.mxu1 %v2453_v1 }
 0x2cd   :  { %2141 = vmatpush3.msra.mxu1 %v2884_v23 }
 0x2ce   :  { %2142 = vmatprep.subr.mxu1 %v2453_v1 }
 0x2cf   :  { %2143 = vmatpush3.msra.mxu1 %v2891_v24 }
 0x2d0   :  { %2144 = vmatprep.subr.mxu1 %v2453_v1 }
 0x2d1   :  { %2145 = vmatpush3.msra.mxu1 %v2898_v25 }
 0x2d2   :  { %2146 = vmatprep.subr.mxu1 %v2453_v1 }
 0x2d3   :  { %2147 = vmatpush3.msra.mxu1 %v2905_v26 }
 0x2d4   :  { %2148 = vmatprep.subr.mxu1 %v2453_v1 }
 0x2d5   :  { %2149 = vmatpush3.msra.mxu1 %v2914_v27 }
 0x2d6   :  { %2207 = vmatprep.subr.mxu1 %v2453_v1 }
 0x31a   :  { %v610_v37 = vpop.f32.mrf.mxu1 }
 0x31b   :  { %v611_v38 = vadd.f32 %v2981_v56, %v610_v37 }
 0x31c   :  { %v2044_v39 = vpop.f32.mrf.mxu1 }
 0x31d   :  { %2400 = vtanh.f32 %v611_v38 }
 0x32a   :  { %v2401_v40 = vpop.eup %2400 }
 0x32b   :  { %697 = vrot.lane.b32.xlu1 %v2401_v40, %s2455_s16 }
 0x376   :  { %v847_v41 = vpop.f32.mrf.mxu1 }
 0x377   :  { %v851_v47 = vadd.f32 %v847_v41, %v777_v46 }
 0x378   :  { %v2117_v42 = vpop.f32.mrf.mxu1 }
 0x379   :  { %2402 = vtanh.f32 %v851_v47  ;;  %v2424_v47 = vld [vmem:[%s3369_s2 + $0x38] sm:$0xff] }
 0x386   :  { %v2403_v50 = vpop.eup %2402 }
 0x39d   :  { %v698_v48 = vpop.permute.xlu1 %697 }
 0x39e   :  { %v700_v49 = vsel %vm108_vm1, %v2399_v36, %v698_v48  ;;  %v2425_v48 = vld [vmem:[%s3369_s2 + $0x30] sm:$0xff] }
 0x39f   :  { %2097 = vmatmul.mubr.f32.vlgmr.msra.gmra.mxu0 %v700_v49  ;;  %v2426_v49 = vld [vmem:[%s3369_s2 + $0x28] sm:$0xff] }
 0x3a0   :  { %2154 = vmatpush3.msra.mxu0 %v2700_v58  ;;  %2169 = vmatprep.mubr.msk.f32.mxu0 %vm2454_vm2, %v2453_v1 }
 0x3a1   :  { %2155 = vmatprep.subr.mxu0 %v2453_v1 }
 0x3a2   :  { %2156 = vmatpush3.msra.mxu0 %v2710_v60 }
 0x3a3   :  { %2157 = vmatprep.subr.mxu0 %v2453_v1 }
 0x3a4   :  { %2158 = vmatpush3.msra.mxu0 %v2721_v62 }
 0x3a5   :  { %2159 = vmatprep.subr.mxu0 %v2453_v1 }
 0x3a6   :  { %2160 = vmatpush3.msra.mxu0 %v2732_v0 }
 0x3a7   :  { %2161 = vmatprep.subr.mxu0 %v2453_v1 }
 0x3a8   :  { %2162 = vmatpush3.msra.mxu0 %v2743_v3 }
 0x3a9   :  { %2163 = vmatprep.subr.mxu0 %v2453_v1 }
 0x3aa   :  { %2164 = vmatpush3.msra.mxu0 %v2757_v6 }
 0x3ab   :  { %2165 = vmatprep.subr.mxu0 %v2453_v1 }
 0x3ac   :  { %2166 = vmatpush3.msra.mxu0 %v2764_v7 }
 0x3ad   :  { %2167 = vmatprep.subr.mxu0 %v2453_v1 }
 0x3ae   :  { %2168 = vmatpush3.msra.mxu0 %v2775_v10 }
 0x3af   :  { %2170 = vmatmul.mubr.msk.f32.vlgmr.msra.gmra.mxu0 %vm108_vm1, %v2403_v50  ;;  %2172 = vmatprep.subr.mxu0 %v2453_v1 }
 0x3b0   :  { %2173 = vmatpush3.msra.mxu0 %v2809_v12  ;;  %2204 = vmatprep.mubr.msk.f32.mxu0 %vm2454_vm2, %v2453_v1 }
 0x3b1   :  { %2174 = vmatprep.subr.mxu0 %v2453_v1 }
 0x3b2   :  { %2175 = vmatpush3.msra.mxu0 %v2816_v13 }
 0x3b3   :  { %2176 = vmatprep.subr.mxu0 %v2453_v1 }
 0x3b4   :  { %2177 = vmatpush3.msra.mxu0 %v2823_v14 }
 0x3b5   :  { %2178 = vmatprep.subr.mxu0 %v2453_v1 }
 0x3b6   :  { %2179 = vmatpush3.msra.mxu0 %v2828_v15 }
 0x3b7   :  { %2180 = vmatprep.subr.mxu0 %v2453_v1 }
 0x3b8   :  { %2181 = vmatpush3.msra.mxu0 %v2835_v16 }
 0x3b9   :  { %2182 = vmatprep.subr.mxu0 %v2453_v1 }
 0x3ba   :  { %2183 = vmatpush3.msra.mxu0 %v2842_v17 }
 0x3bb   :  { %2184 = vmatprep.subr.mxu0 %v2453_v1 }
 0x3bc   :  { %2185 = vmatpush3.msra.mxu0 %v2851_v18 }
 0x3bd   :  { %2186 = vmatprep.subr.mxu0 %v2453_v1 }
 0x3be   :  { %2187 = vmatpush3.msra.mxu0 %v2858_v19 }
 0x3bf   :  { %2188 = vmatprep.subr.mxu0 %v2453_v1 }
 0x3c0   :  { %2189 = vmatpush3.msra.mxu0 %v2865_v20 }
 0x3c1   :  { %2190 = vmatprep.subr.mxu0 %v2453_v1 }
 0x3c2   :  { %2191 = vmatpush3.msra.mxu0 %v2871_v21 }
 0x3c3   :  { %2192 = vmatprep.subr.mxu0 %v2453_v1 }
 0x3c4   :  { %2193 = vmatpush3.msra.mxu0 %v2877_v22 }
 0x3c5   :  { %2194 = vmatprep.subr.mxu0 %v2453_v1 }
 0x3c6   :  { %2195 = vmatpush3.msra.mxu0 %v2884_v23 }
 0x3c7   :  { %2196 = vmatprep.subr.mxu0 %v2453_v1 }
 0x3c8   :  { %2197 = vmatpush3.msra.mxu0 %v2891_v24 }
 0x3c9   :  { %2198 = vmatprep.subr.mxu0 %v2453_v1 }
 0x3ca   :  { %2199 = vmatpush3.msra.mxu0 %v2898_v25 }
 0x3cb   :  { %2200 = vmatprep.subr.mxu0 %v2453_v1 }
 0x3cc   :  { %2201 = vmatpush3.msra.mxu0 %v2905_v26 }
 0x3cd   :  { %2202 = vmatprep.subr.mxu0 %v2453_v1 }
 0x3ce   :  { %2203 = vmatpush3.msra.mxu0 %v2914_v27 }
 0x3cf   :  { %2261 = vmatprep.subr.mxu0 %v2453_v1 }
 0x45f   :  { %v767_v51 = vpop.f32.mrf.mxu0 }
 0x460   :  { %v768_v52 = vadd.f32 %v2981_v56, %v767_v51  ;;  %v2428_v51 = vld [vmem:[%s3369_s2 + $0x18] sm:$0xff] }
 0x461   :  { %v2098_v53 = vpop.f32.mrf.mxu0 }
 0x462   :  { %2404 = vtanh.f32 %v768_v52  ;;  %v2429_v52 = vld [vmem:[%s3369_s2 + $0x10] sm:$0xff]  ;;  %v2430_v53 = vld [vmem:[%s3369_s2 + $0x8] sm:$0xff] }
 0x46f   :  { %v2405_v59 = vpop.eup %2404  ;;  %v1004_v63 = vpop.f32.mrf.mxu0 }
 0x470   :  { %v1008_v2 = vadd.f32 %v1004_v63, %v934_v61  ;;  %854 = vrot.lane.b32.xlu1 %v2405_v59, %s2455_s16  ;;  %v1571_v61 = vld [vmem:[%s3373_s6 + $0x38] sm:$0xff]  ;;  %v1570_v63 = vld [vmem:[%s3373_s6 + $0x30] sm:$0xff] }
 0x471   :  { %v2171_v4 = vpop.f32.mrf.mxu0 }
 0x472   :  { %2406 = vtanh.f32 %v1008_v2  ;;  %v1569_v2 = vld [vmem:[%s3373_s6 + $0x28] sm:$0xff]  ;;  %v1568_v4 = vld [vmem:[%s3373_s6 + $0x20] sm:$0xff] }
 0x47f   :  { %v2407_v9 = vpop.eup %2406 }
 0x4e2   :  { %v855_v5 = vpop.permute.xlu1 %854 }
 0x4e3   :  { %v857_v8 = vsel %vm108_vm1, %v2403_v50, %v855_v5  ;;  %v2427_v50 = vld [vmem:[%s3369_s2 + $0x20] sm:$0xff]  ;;  %v1567_v5 = vld [vmem:[%s3373_s6 + $0x18] sm:$0xff] }
 0x4e4   :  { %2151 = vmatmul.mubr.f32.vlgmr.msra.gmra.mxu1 %v857_v8  ;;  %v1566_v8 = vld [vmem:[%s3373_s6 + $0x10] sm:$0xff] }
 0x4e5   :  { %2208 = vmatpush3.msra.mxu1 %v2700_v58  ;;  %2223 = vmatprep.mubr.msk.f32.mxu1 %vm2454_vm2, %v2453_v1 }
 0x4e6   :  { %2209 = vmatprep.subr.mxu1 %v2453_v1 }
 0x4e7   :  { %2210 = vmatpush3.msra.mxu1 %v2710_v60 }
 0x4e8   :  { %2211 = vmatprep.subr.mxu1 %v2453_v1 }
 0x4e9   :  { %2212 = vmatpush3.msra.mxu1 %v2721_v62 }
 0x4ea   :  { %2213 = vmatprep.subr.mxu1 %v2453_v1 }
 0x4eb   :  { %2214 = vmatpush3.msra.mxu1 %v2732_v0 }
 0x4ec   :  { %2215 = vmatprep.subr.mxu1 %v2453_v1 }
 0x4ed   :  { %2216 = vmatpush3.msra.mxu1 %v2743_v3 }
 0x4ee   :  { %2217 = vmatprep.subr.mxu1 %v2453_v1 }
 0x4ef   :  { %2218 = vmatpush3.msra.mxu1 %v2757_v6 }
 0x4f0   :  { %2219 = vmatprep.subr.mxu1 %v2453_v1 }
 0x4f1   :  { %2220 = vmatpush3.msra.mxu1 %v2764_v7 }
 0x4f2   :  { %2221 = vmatprep.subr.mxu1 %v2453_v1 }
 0x4f3   :  { %2222 = vmatpush3.msra.mxu1 %v2775_v10 }
 0x4f4   :  { %2224 = vmatmul.mubr.msk.f32.vlgmr.msra.gmra.mxu1 %vm108_vm1, %v2407_v9  ;;  %2226 = vmatprep.subr.mxu1 %v2453_v1 }
 0x4f5   :  { %2227 = vmatpush3.msra.mxu1 %v2809_v12  ;;  %2258 = vmatprep.mubr.msk.f32.mxu1 %vm2454_vm2, %v2453_v1 }
 0x4f6   :  { %2228 = vmatprep.subr.mxu1 %v2453_v1 }
 0x4f7   :  { %2229 = vmatpush3.msra.mxu1 %v2816_v13 }
 0x4f8   :  { %2230 = vmatprep.subr.mxu1 %v2453_v1 }
 0x4f9   :  { %2231 = vmatpush3.msra.mxu1 %v2823_v14 }
 0x4fa   :  { %2232 = vmatprep.subr.mxu1 %v2453_v1 }
 0x4fb   :  { %2233 = vmatpush3.msra.mxu1 %v2828_v15 }
 0x4fc   :  { %2234 = vmatprep.subr.mxu1 %v2453_v1 }
 0x4fd   :  { %2235 = vmatpush3.msra.mxu1 %v2835_v16 }
 0x4fe   :  { %2236 = vmatprep.subr.mxu1 %v2453_v1 }
 0x4ff   :  { %2237 = vmatpush3.msra.mxu1 %v2842_v17 }
 0x500   :  { %2238 = vmatprep.subr.mxu1 %v2453_v1 }
 0x501   :  { %2239 = vmatpush3.msra.mxu1 %v2851_v18 }
 0x502   :  { %2240 = vmatprep.subr.mxu1 %v2453_v1 }
 0x503   :  { %2241 = vmatpush3.msra.mxu1 %v2858_v19 }
 0x504   :  { %2242 = vmatprep.subr.mxu1 %v2453_v1 }
 0x505   :  { %2243 = vmatpush3.msra.mxu1 %v2865_v20 }
 0x506   :  { %2244 = vmatprep.subr.mxu1 %v2453_v1 }
 0x507   :  { %2245 = vmatpush3.msra.mxu1 %v2871_v21 }
 0x508   :  { %2246 = vmatprep.subr.mxu1 %v2453_v1 }
 0x509   :  { %2247 = vmatpush3.msra.mxu1 %v2877_v22 }
 0x50a   :  { %2248 = vmatprep.subr.mxu1 %v2453_v1 }
 0x50b   :  { %2249 = vmatpush3.msra.mxu1 %v2884_v23 }
 0x50c   :  { %2250 = vmatprep.subr.mxu1 %v2453_v1 }
 0x50d   :  { %2251 = vmatpush3.msra.mxu1 %v2891_v24 }
 0x50e   :  { %2252 = vmatprep.subr.mxu1 %v2453_v1 }
 0x50f   :  { %2253 = vmatpush3.msra.mxu1 %v2898_v25 }
 0x510   :  { %2254 = vmatprep.subr.mxu1 %v2453_v1 }
 0x511   :  { %2255 = vmatpush3.msra.mxu1 %v2905_v26 }
 0x512   :  { %2256 = vmatprep.subr.mxu1 %v2453_v1 }
 0x513   :  { %2257 = vmatpush3.msra.mxu1 %v2914_v27 }
 0x514   :  { %2315 = vmatprep.subr.mxu1 %v2453_v1 }
 0x5a4   :  { %v924_v11 = vpop.f32.mrf.mxu1 }
 0x5a5   :  { %v925_v28 = vadd.f32 %v2981_v56, %v924_v11  ;;  %v1564_v11 = vld [vmem:[%s3373_s6] sm:$0xff] }
 0x5a6   :  { %v2152_v29 = vpop.f32.mrf.mxu1 }
 0x5a7   :  { %2408 = vtanh.f32 %v925_v28 }
 0x5b4   :  { %v2409_v33 = vpop.eup %2408  ;;  %v1161_v35 = vpop.f32.mrf.mxu1 }
 0x5b5   :  { %v1165_v36 = vadd.f32 %v1161_v35, %v1091_v34  ;;  %1011 = vrot.lane.b32.xlu0 %v2409_v33, %s2455_s16  ;;  %v1680_v33 = vld [vmem:[%s3374_s7] ss:$0 sm:$0xff] }
 0x5b6   :  { %v2225_v37 = vpop.f32.mrf.mxu1 }
 0x5b7   :  { %2410 = vtanh.f32 %v1165_v36 }
 0x627   :  { %v1012_v38 = vpop.permute.xlu0 %1011 }
 0x628   :  { %v1014_v39 = vsel %vm108_vm1, %v2407_v9, %v1012_v38  ;;  %v1565_v9 = vld [vmem:[%s3373_s6 + $0x8] sm:$0xff]  ;;  %s2456_s6 = smov [#allocation5]  }
 0x629   :  { %2205 = vmatmul.mubr.f32.vlgmr.msra.gmra.mxu0 %v1014_v39  ;;  %s1660_s30 = sshll.u32 %s2456_s6, 4  ;;  %s1661_s30 = int_to_ptr.vmem [resolvable:$true] %s1660_s30 }
 0x62a   :  { %2262 = vmatpush3.msra.mxu0 %v2700_v58  ;;  %2277 = vmatprep.mubr.msk.f32.mxu0 %vm2454_vm2, %v2453_v1  ;;  %v2411_v58 = vpop.eup %2410  ;;  %s2431_s1 = scalar_lea.vmem %s1661_s30, 32  ;;  %p2436_p1 = scmp.lt.s32.totalorder %s1661_s30, %s1661_s30 }
 0x62b   :  { %2263 = vmatprep.subr.mxu0 %v2453_v1  ;;  %p2432_p0 = scmp.ne.s32.totalorder %s1661_s30, %s2431_s1  ;;  %p2437_p2 = scmp.lt.s32.totalorder %s2431_s1, %s2431_s1 }
 0x62c   :  { %2264 = vmatpush3.msra.mxu0 %v2710_v60 }
 0x62d   :  { %2265 = vmatprep.subr.mxu0 %v2453_v1  ;;  %p2438_p3 = por %p2437_p2, %p2436_p1 }
 0x62e   :  { %2266 = vmatpush3.msra.mxu0 %v2721_v62 }
 0x62f   :  { %2267 = vmatprep.subr.mxu0 %v2453_v1  ;;  %p2439_p4 = pnand %p2438_p3, %p2432_p0 }
 0x630   :  { %2268 = vmatpush3.msra.mxu0 %v2732_v0 }
 0x631   :  { %2269 = vmatprep.subr.mxu0 %v2453_v1 }
 0x632   :  { %2270 = vmatpush3.msra.mxu0 %v2743_v3  ;;  %v1244_v3 = vld [vmem:[#allocation4 + $0xe] sm:$0x1] }
 0x633   :  { %2271 = vmatprep.subr.mxu0 %v2453_v1 }
 0x634   :  { %2272 = vmatpush3.msra.mxu0 %v2757_v6  ;;  %v1246_v6 = vrot.slane %v1244_v3, 7 }
 0x635   :  { %2273 = vmatprep.subr.mxu0 %v2453_v1 }
 0x636   :  { %2274 = vmatpush3.msra.mxu0 %v2764_v7  ;;  %v1243_v7 = vld [vmem:[#allocation4 + $0x6] sm:$0x1] }
 0x637   :  { %2275 = vmatprep.subr.mxu0 %v2453_v1  ;;  %v1248_v41 = vsel %vm305_vm3, %v1243_v7, %v1246_v6 }
 0x638   :  { %2276 = vmatpush3.msra.mxu0 %v2775_v10 }
 0x639   :  { %2278 = vmatmul.mubr.msk.f32.vlgmr.msra.gmra.mxu0 %vm108_vm1, %v2411_v58  ;;  %2280 = vmatprep.subr.mxu0 %v2453_v1 }
 0x63a   :  { %2281 = vmatpush3.msra.mxu0 %v2809_v12  ;;  %2312 = vmatprep.mubr.msk.f32.mxu0 %vm2454_vm2, %v2453_v1 }
 0x63b   :  { %2282 = vmatprep.subr.mxu0 %v2453_v1 }
 0x63c   :  { %2283 = vmatpush3.msra.mxu0 %v2816_v13 }
 0x63d   :  { %2284 = vmatprep.subr.mxu0 %v2453_v1 }
 0x63e   :  { %2285 = vmatpush3.msra.mxu0 %v2823_v14 }
 0x63f   :  { %2286 = vmatprep.subr.mxu0 %v2453_v1 }
 0x640   :  { %2287 = vmatpush3.msra.mxu0 %v2828_v15 }
 0x641   :  { %2288 = vmatprep.subr.mxu0 %v2453_v1 }
 0x642   :  { %2289 = vmatpush3.msra.mxu0 %v2835_v16 }
 0x643   :  { %2290 = vmatprep.subr.mxu0 %v2453_v1 }
 0x644   :  { %2291 = vmatpush3.msra.mxu0 %v2842_v17 }
 0x645   :  { %2292 = vmatprep.subr.mxu0 %v2453_v1 }
 0x646   :  { %2293 = vmatpush3.msra.mxu0 %v2851_v18 }
 0x647   :  { %2294 = vmatprep.subr.mxu0 %v2453_v1 }
 0x648   :  { %2295 = vmatpush3.msra.mxu0 %v2858_v19 }
 0x649   :  { %2296 = vmatprep.subr.mxu0 %v2453_v1 }
 0x64a   :  { %2297 = vmatpush3.msra.mxu0 %v2865_v20 }
 0x64b   :  { %2298 = vmatprep.subr.mxu0 %v2453_v1 }
 0x64c   :  { %2299 = vmatpush3.msra.mxu0 %v2871_v21 }
 0x64d   :  { %2300 = vmatprep.subr.mxu0 %v2453_v1 }
 0x64e   :  { %2301 = vmatpush3.msra.mxu0 %v2877_v22 }
 0x64f   :  { %2302 = vmatprep.subr.mxu0 %v2453_v1 }
 0x650   :  { %2303 = vmatpush3.msra.mxu0 %v2884_v23 }
 0x651   :  { %2304 = vmatprep.subr.mxu0 %v2453_v1 }
 0x652   :  { %2305 = vmatpush3.msra.mxu0 %v2891_v24 }
 0x653   :  { %2306 = vmatprep.subr.mxu0 %v2453_v1 }
 0x654   :  { %2307 = vmatpush3.msra.mxu0 %v2898_v25 }
 0x655   :  { %2308 = vmatprep.subr.mxu0 %v2453_v1 }
 0x656   :  { %2309 = vmatpush3.msra.mxu0 %v2905_v26 }
 0x657   :  { %2310 = vmatprep.subr.mxu0 %v2453_v1 }
 0x658   :  { %2311 = vmatpush3.msra.mxu0 %v2914_v27 }
 0x659   :  { %2369 = vmatprep.subr.mxu0 %v2453_v1 }
 0x6e9   :  { %v1081_v60 = vpop.f32.mrf.mxu0 }
 0x6ea   :  { %v1082_v62 = vadd.f32 %v2981_v56, %v1081_v60 }
 0x6eb   :  { %v2206_v0 = vpop.f32.mrf.mxu0 }
 0x6ec   :  { %2412 = vtanh.f32 %v1082_v62 }
 0x6f9   :  { %v2413_v40 = vpop.eup %2412  ;;  %v1318_v42 = vpop.f32.mrf.mxu0 }
 0x6fa   :  { %v1322_v43 = vadd.f32 %v1318_v42, %v1248_v41  ;;  %1168 = vrot.lane.b32.xlu1 %v2413_v40, %s2455_s16 }
 0x6fb   :  { %v2279_v44 = vpop.f32.mrf.mxu0 }
 0x6fc   :  { %2414 = vtanh.f32 %v1322_v43 }
 0x709   :  { %v2415_v54 = vpop.eup %2414 }
 0x76c   :  { %v1169_v45 = vpop.permute.xlu1 %1168 }
 0x76d   :  { %v1171_v46 = vsel %vm108_vm1, %v2411_v58, %v1169_v45 }
 0x76e   :  { %2259 = vmatmul.mubr.f32.vlgmr.msra.gmra.mxu1 %v1171_v46 }
 0x76f   :  { %2316 = vmatpush3.msra.mxu1 %v2424_v47  ;;  %2331 = vmatprep.mubr.msk.f32.mxu1 %vm2454_vm2, %v2453_v1 }
 0x770   :  { %2317 = vmatprep.subr.mxu1 %v2453_v1 }
 0x771   :  { %2318 = vmatpush3.msra.mxu1 %v2425_v48 }
 0x772   :  { %2319 = vmatprep.subr.mxu1 %v2453_v1 }
 0x773   :  { %2320 = vmatpush3.msra.mxu1 %v2426_v49 }
 0x774   :  { %2321 = vmatprep.subr.mxu1 %v2453_v1 }
 0x775   :  { %2322 = vmatpush3.msra.mxu1 %v2427_v50 }
 0x776   :  { %2323 = vmatprep.subr.mxu1 %v2453_v1 }
 0x777   :  { %2324 = vmatpush3.msra.mxu1 %v2428_v51 }
 0x778   :  { %2325 = vmatprep.subr.mxu1 %v2453_v1 }
 0x779   :  { %2326 = vmatpush3.msra.mxu1 %v2429_v52 }
 0x77a   :  { %2327 = vmatprep.subr.mxu1 %v2453_v1 }
 0x77b   :  { %2328 = vmatpush3.msra.mxu1 %v2430_v53 }
 0x77c   :  { %2329 = vmatprep.subr.mxu1 %v2453_v1 }
 0x77d   :  { %2330 = vmatpush3.msra.mxu1 %v2775_v10 }
 0x77e   :  { %2332 = vmatmul.mubr.msk.f32.vlgmr.msra.gmra.mxu1 %vm108_vm1, %v2415_v54  ;;  %2334 = vmatprep.subr.mxu1 %v2453_v1 }
 0x77f   :  { %2335 = vmatpush3.msra.mxu1 %v2809_v12  ;;  %2366 = vmatprep.mubr.msk.f32.mxu1 %vm2454_vm2, %v2453_v1 }
 0x780   :  { %2336 = vmatprep.subr.mxu1 %v2453_v1 }
 0x781   :  { %2337 = vmatpush3.msra.mxu1 %v2816_v13 }
 0x782   :  { %2338 = vmatprep.subr.mxu1 %v2453_v1 }
 0x783   :  { %2339 = vmatpush3.msra.mxu1 %v2823_v14  ;;  %v1401_v14 = vld [vmem:[#allocation4 + $0xf] sm:$0x1] }
 0x784   :  { %2340 = vmatprep.subr.mxu1 %v2453_v1 }
 0x785   :  { %2341 = vmatpush3.msra.mxu1 %v2828_v15  ;;  %v1403_v15 = vrot.slane %v1401_v14, 7 }
 0x786   :  { %2342 = vmatprep.subr.mxu1 %v2453_v1 }
 0x787   :  { %2343 = vmatpush3.msra.mxu1 %v2835_v16  ;;  %v1400_v16 = vld [vmem:[#allocation4 + $0x7] sm:$0x1] }
 0x788   :  { %2344 = vmatprep.subr.mxu1 %v2453_v1 }
 0x789   :  { %2345 = vmatpush3.msra.mxu1 %v2842_v17 }
 0x78a   :  { %2346 = vmatprep.subr.mxu1 %v2453_v1 }
 0x78b   :  { %2347 = vmatpush3.msra.mxu1 %v2851_v18  ;;  %v1405_v18 = vsel %vm305_vm3, %v1400_v16, %v1403_v15 }
 0x78c   :  { %2348 = vmatprep.subr.mxu1 %v2453_v1 }
 0x78d   :  { %2349 = vmatpush3.msra.mxu1 %v2858_v19 }
 0x78e   :  { %2350 = vmatprep.subr.mxu1 %v2453_v1 }
 0x78f   :  { %2351 = vmatpush3.msra.mxu1 %v2865_v20 }
 0x790   :  { %2352 = vmatprep.subr.mxu1 %v2453_v1 }
 0x791   :  { %2353 = vmatpush3.msra.mxu1 %v2871_v21 }
 0x792   :  { %2354 = vmatprep.subr.mxu1 %v2453_v1 }
 0x793   :  { %2355 = vmatpush3.msra.mxu1 %v2877_v22 }
 0x794   :  { %2356 = vmatprep.subr.mxu1 %v2453_v1 }
 0x795   :  { %2357 = vmatpush3.msra.mxu1 %v2884_v23 }
 0x796   :  { %2358 = vmatprep.subr.mxu1 %v2453_v1 }
 0x797   :  { %2359 = vmatpush3.msra.mxu1 %v2891_v24 }
 0x798   :  { %2360 = vmatprep.subr.mxu1 %v2453_v1 }
 0x799   :  { %2361 = vmatpush3.msra.mxu1 %v2898_v25 }
 0x79a   :  { %2362 = vmatprep.subr.mxu1 %v2453_v1 }
 0x79b   :  { %2363 = vmatpush3.msra.mxu1 %v2905_v26 }
 0x79c   :  { %2364 = vmatprep.subr.mxu1 %v2453_v1 }
 0x79d   :  { %2365 = vmatpush3.msra.mxu1 %v2914_v27 }
 0x82e   :  { %v1238_v10 = vpop.f32.mrf.mxu1 }
 0x82f   :  { %v1239_v12 = vadd.f32 %v2981_v56, %v1238_v10 }
 0x830   :  { %v2260_v13 = vpop.f32.mrf.mxu1 }
 0x831   :  { %2416 = vtanh.f32 %v1239_v12 }
 0x83e   :  { %v2417_v17 = vpop.eup %2416  ;;  %v1475_v19 = vpop.f32.mrf.mxu1 }
 0x83f   :  { %v1479_v20 = vadd.f32 %v1475_v19, %v1405_v18  ;;  %1325 = vrot.lane.b32.xlu0 %v2417_v17, %s2455_s16 }
 0x840   :  { %v2333_v21 = vpop.f32.mrf.mxu1 }
 0x841   :  { %2418 = vtanh.f32 %v1479_v20 }
 0x84e   :  { %v2419_v22 = vpop.eup %2418 }
 0x84f   :  { %1558 = vst.msk [vmem:[#allocation2] sm:$0x3] %vm34_vm0, %v2419_v22 }
 0x8b1   :  { %v1326_v23 = vpop.permute.xlu0 %1325 }
 0x8b2   :  { %v1328_v24 = vsel %vm108_vm1, %v2415_v54, %v1326_v23 }
 0x8b3   :  { %2313 = vmatmul.mubr.f32.vlgmr.msra.gmra.mxu0 %v1328_v24 }
 0x8b4   :  { %2385 = vmatprep.mubr.msk.f32.mxu0 %vm2454_vm2, %v2453_v1  ;;  %2370 = vmatpush3.msra.mxu0 %v1571_v61 }
 0x8b5   :  { %2371 = vmatprep.subr.mxu0 %v2453_v1 }
 0x8b6   :  { %2372 = vmatpush3.msra.mxu0 %v1570_v63 }
 0x8b7   :  { %2373 = vmatprep.subr.mxu0 %v2453_v1 }
 0x8b8   :  { %2374 = vmatpush3.msra.mxu0 %v1569_v2 }
 0x8b9   :  { %2375 = vmatprep.subr.mxu0 %v2453_v1 }
 0x8ba   :  { %2376 = vmatpush3.msra.mxu0 %v1568_v4 }
 0x8bb   :  { %2377 = vmatprep.subr.mxu0 %v2453_v1 }
 0x8bc   :  { %2378 = vmatpush3.msra.mxu0 %v1567_v5 }
 0x8bd   :  { %2379 = vmatprep.subr.mxu0 %v2453_v1 }
 0x8be   :  { %2380 = vmatpush3.msra.mxu0 %v1566_v8 }
 0x8bf   :  { %2381 = vmatprep.subr.mxu0 %v2453_v1 }
 0x8c0   :  { %2382 = vmatpush3.msra.mxu0 %v1565_v9 }
 0x8c1   :  { %2383 = vmatprep.subr.mxu0 %v2453_v1 }
 0x8c2   :  { %2384 = vmatpush3.msra.mxu0 %v1564_v11 }
 0x973   :  { %v1395_v25 = vpop.f32.mrf.mxu0 }
 0x974   :  { %v1396_v26 = vadd.f32 %v2981_v56, %v1395_v25 }
 0x975   :  { %v2314_v27 = vpop.f32.mrf.mxu0 }
 0x976   :  { %2420 = vtanh.f32 %v1396_v26 }
 0x983   :  { %v2421_v55 = vpop.eup %2420 }
 0x984   :  { %1482 = vrot.lane.b32.xlu1 %v2421_v55, %s2455_s16 }
 0x9f6   :  { %v1483_v57 = vpop.permute.xlu1 %1482 }
 0x9f7   :  { %v1485_v59 = vsel %vm108_vm1, %v2419_v22, %v1483_v57 }
 0x9f8   :  { %2367 = vmatmul.mubr.f32.vlgmr.msra.gmra.mxu1 %v1485_v59 }
 0xab8   :  { %v1552_v28 = vpop.f32.mrf.mxu1 }
 0xab9   :  { %v1553_v29 = vadd.f32 %v2981_v56, %v1552_v28 }
 0xaba   :  { %v2368_v30 = vpop.f32.mrf.mxu1 }
 0xabb   :  { %2422 = vtanh.f32 %v1553_v29 }
 0xac8   :  { %v2423_v31 = vpop.eup %2422 }
 0xac9   :  { %1559 = vst.msk [vmem:[#allocation3] sm:$0x3] %vm34_vm0, %v2423_v31  ;;  %v1563_v32 = vmax.f32 %v2423_v31, 0.0 }
 0xacb   :  { %2386 = vmatmul.mubr.msk.f32.vlgmr.msra.gmra.mxu0 %vm108_vm1, %v1563_v32 }
 0xb8b   :  { %v1648_v34 = vpop.f32.mrf.mxu0 }
 0xb8c   :  { %v1649_v1 = vadd.f32 %v1680_v33, %v1648_v34 }
 0xb8d   :  { %v2387_v35 = vpop.f32.mrf.mxu0 }
 0xb8e   :  { %1653 = vst.msk [vmem:[#allocation5] sm:$0x3] %vm1652_vm4, %v1649_v1 }
 0xb8f   :  { %2442 = shalt.err (!%p2439_p4)
}
 0xb90   :  { %1663 = dma.vmem_to_hbm [thread:$0]  %s1661_s30, 32, %s3375_s8, [#allocation6]  }
 0xb91   :  { %2451 = dma.done.wait [#allocation6], 32  }
 0xb92   :  { %2452 = vsyncadd [#allocation6], 4294967264 }
 0xb93   :  { %1667 = vsyncpa [#allocation6], 1 }

</bundles_post_ra>
